<compile_context>
chip_gen: v6e
topology: v6e:2x2x1
jax: 0.10.0
libtpu: 0.0.40
codegen_flags: <defaults>
</compile_context>

<pallas_src>
import math
from functools import partial

import jax
import jax.numpy as jnp
from jax import lax
from jax.experimental import pallas as pl
from jax.experimental.pallas import tpu as pltpu


@partial(jax.jit, static_argnames=("stride", "padding"))
def conv2d_pallas(x, w, b, *, stride=2, padding=3):
    """x: (N, C, H, W) f32, w: (O, C, KH, KW) f32, b: (O,) f32 -> (N, O, Hout, Wout)."""
    N, C, H, W = x.shape
    O, _, KH, KW = w.shape
    s = stride
    Hout = (H + 2 * padding - KH) // s + 1
    Wout = (W + 2 * padding - KW) // s + 1

    dh_max = (KH - 1) // s
    dw_max = (KW - 1) // s
    Hp = Hout + dh_max                  # rows per polyphase plane
    Wp = Wout + dw_max                  # cols per polyphase plane ("wide" rows)
    P = Hout * Wp                       # flattened wide-output length (lane axis)
    L = Hp * Wp + dw_max                # flattened plane length (+tail so every
                                        #  tap slice stays in bounds)

    # ---- host prologue: pad + polyphase split (one pass, no 49x expansion) ----
    pad_h_hi = s * Hp - H - padding
    pad_w_hi = s * Wp - W - padding
    assert pad_h_hi >= 0 and pad_w_hi >= 0
    xp = jnp.pad(x, ((0, 0), (0, 0), (padding, pad_h_hi), (padding, pad_w_hi)))
    xp = xp.reshape(N, C, Hp, s, Wp, s)
    xp = xp.transpose(0, 3, 5, 1, 2, 4)                  # (N, ph, pw, C, Hp, Wp)
    xp = xp.reshape(N, s, s, C, Hp * Wp)
    xf = jnp.pad(xp, ((0, 0),) * 4 + ((0, dw_max),))     # (N, s, s, C, L)

    # Weight taps: w_t[kh*KW + kw] = w[:, :, kh, kw]  -> (O, C)
    w_t = w.transpose(2, 3, 0, 1).reshape(KH * KW, O, C)
    b_col = b.reshape(O, 1)

    # ---- Pallas kernel: KH*KW tap-GEMMs, f32 accumulation, transposed output --
    def kernel(x_ref, w_ref, b_ref, o_ref):
        # x_ref: (s, s, C, L)   w_ref: (KH*KW, O, C)   b_ref: (O, 1)   o_ref: (O, P)
        acc = jnp.zeros((O, P), jnp.float32)
        for kh in range(KH):
            ph, dh = kh % s, kh // s
            for kw in range(KW):
                pw, dw = kw % s, kw // s
                w_tap = w_ref[kh * KW + kw]                        # (O, C)
                slab = x_ref[ph, pw, :, pl.ds(dh * Wp + dw, P)]    # (C, P) contiguous
                acc = acc + jnp.dot(w_tap, slab,
                                    preferred_element_type=jnp.float32)
        o_ref[...] = acc + b_ref[...]                              # bias broadcast

    out_wide = pl.pallas_call(
        kernel,
        out_shape=jax.ShapeDtypeStruct((N, O, P), jnp.float32),
        grid=(N,),
        in_specs=[
            pl.BlockSpec((None, s, s, C, L), lambda n: (n, 0, 0, 0, 0)),
            pl.BlockSpec((KH * KW, O, C), lambda n: (0, 0, 0)),   # resident weights
            pl.BlockSpec((O, 1), lambda n: (0, 0)),               # resident bias
        ],
        out_specs=pl.BlockSpec((None, O, P), lambda n: (n, 0, 0)),
        compiler_params=pltpu.CompilerParams(
            dimension_semantics=("parallel",),
            vmem_limit_bytes=32 * 1024 * 1024,   # safe on v7x (64 MiB phys) too
        ),
    )(xf, w_t, b_col)

    # ---- epilogue: drop the (Wp - Wout) scratch columns; already NCHW ---------
    out = out_wide.reshape(N, O, Hout, Wp)[:, :, :, :Wout]
    return out


if __name__ == "__main__":
    key = jax.random.PRNGKey(0)
    k1, k2, k3 = jax.random.split(key, 3)

    # Small shapes consistent with the module: batch=2, C_in=4, C_out=8, 16x16.
    N, C, H, W = 2, 4, 16, 16
    O, KH, KW = 8, 7, 7

    x = jax.random.normal(k1, (N, C, H, W), dtype=jnp.float32)

    # Deterministic init mimicking torch.nn.Conv2d defaults (kaiming-uniform bounds).
    fan_in = C * KH * KW
    bound = 1.0 / math.sqrt(fan_in)
    w = jax.random.uniform(k2, (O, C, KH, KW), minval=-bound, maxval=bound,
                           dtype=jnp.float32)
    b = jax.random.uniform(k3, (O,), minval=-bound, maxval=bound, dtype=jnp.float32)

    out = conv2d_pallas(x, w, b)
    out = jax.block_until_ready(out)

    # Reference: XLA's native conv (same semantics as the PyTorch module).
    ref = lax.conv_general_dilated(
        x, w, window_strides=(2, 2), padding=((3, 3), (3, 3)),
        dimension_numbers=("NCHW", "OIHW", "NCHW"),
        precision=lax.Precision.HIGHEST,
    ) + b.reshape(1, O, 1, 1)

    Hout = (H + 2 * 3 - KH) // 2 + 1
    Wout = (W + 2 * 3 - KW) // 2 + 1
    assert out.shape == (N, O, Hout, Wout), out.shape
    # Kernel uses DEFAULT MXU precision (single bf16 pass), hence the 2e-2 tolerance.
    assert jnp.allclose(out, ref, rtol=2e-2, atol=2e-2), "mismatch vs reference conv"

    print("KERNEL_OK")
</pallas_src>

<mosaic_0001>
module attributes {stable_mosaic.version = 11 : i64} {
  func.func @kernel(%arg0: i32, %arg1: memref<1x2x2x4x124xf32, #tpu.memory_space<vmem>>, %arg2: memref<49x8x4xf32, #tpu.memory_space<vmem>>, %arg3: memref<8x1xf32, #tpu.memory_space<vmem>>, %arg4: memref<1x8x88xf32, #tpu.memory_space<vmem>>) attributes {dimension_semantics = [#tpu.dimension_semantics<parallel>], iteration_bounds = array<i64: 2>, scalar_prefetch = 0 : i64, scratch_operands = 0 : i64, tpu.core_type = #tpu.core_type<tc>, window_params = [{transform_indices = @transform_0, window_bounds = array<i64: 1, 2, 2, 4, 124>}, {pipeline_mode = #tpu.pipeline_mode<synchronous>, transform_indices = @transform_1, window_bounds = array<i64: 49, 8, 4>}, {pipeline_mode = #tpu.pipeline_mode<synchronous>, transform_indices = @transform_2, window_bounds = array<i64: 8, 1>}, {transform_indices = @transform_3, window_bounds = array<i64: 1, 8, 88>}]} {
    %cst = arith.constant 0.000000e+00 : f32
    %0 = vector.broadcast %cst : f32 to vector<8x88xf32>
    %c0 = arith.constant 0 : index
    %c0_0 = arith.constant 0 : index
    %c0_1 = arith.constant 0 : index
    %1 = vector.load %arg2[%c0, %c0_0, %c0_1] : memref<49x8x4xf32, #tpu.memory_space<vmem>>, vector<1x8x4xf32>
    %2 = vector.shape_cast %1 : vector<1x8x4xf32> to vector<8x4xf32>
    %c0_2 = arith.constant 0 : index
    %c0_3 = arith.constant 0 : index
    %c0_4 = arith.constant 0 : index
    %c0_5 = arith.constant 0 : index
    %c0_6 = arith.constant 0 : index
    %3 = vector.load %arg1[%c0_2, %c0_3, %c0_4, %c0_5, %c0_6] : memref<1x2x2x4x124xf32, #tpu.memory_space<vmem>>, vector<1x1x1x4x88xf32>
    %4 = vector.shape_cast %3 : vector<1x1x1x4x88xf32> to vector<4x88xf32>
    %cst_7 = arith.constant dense<0.000000e+00> : vector<8x88xf32>
    %5 = tpu.matmul %2, %4, %cst_7 {dimension_numbers = #tpu.dot_dimension_numbers<[1], [0], [0], [1], [0, 0, 1, 1], [], []>} : vector<8x4xf32>, vector<4x88xf32>, vector<8x88xf32> -> vector<8x88xf32>
    %6 = arith.addf %0, %5 : vector<8x88xf32>
    %c1 = arith.constant 1 : index
    %c0_8 = arith.constant 0 : index
    %c0_9 = arith.constant 0 : index
    %7 = vector.load %arg2[%c1, %c0_8, %c0_9] : memref<49x8x4xf32, #tpu.memory_space<vmem>>, vector<1x8x4xf32>
    %8 = vector.shape_cast %7 : vector<1x8x4xf32> to vector<8x4xf32>
    %c0_10 = arith.constant 0 : index
    %c0_11 = arith.constant 0 : index
    %c1_12 = arith.constant 1 : index
    %c0_13 = arith.constant 0 : index
    %c0_14 = arith.constant 0 : index
    %9 = vector.load %arg1[%c0_10, %c0_11, %c1_12, %c0_13, %c0_14] : memref<1x2x2x4x124xf32, #tpu.memory_space<vmem>>, vector<1x1x1x4x88xf32>
    %10 = vector.shape_cast %9 : vector<1x1x1x4x88xf32> to vector<4x88xf32>
    %cst_15 = arith.constant dense<0.000000e+00> : vector<8x88xf32>
    %11 = tpu.matmul %8, %10, %cst_15 {dimension_numbers = #tpu.dot_dimension_numbers<[1], [0], [0], [1], [0, 0, 1, 1], [], []>} : vector<8x4xf32>, vector<4x88xf32>, vector<8x88xf32> -> vector<8x88xf32>
    %12 = arith.addf %6, %11 : vector<8x88xf32>
    %c2 = arith.constant 2 : index
    %c0_16 = arith.constant 0 : index
    %c0_17 = arith.constant 0 : index
    %13 = vector.load %arg2[%c2, %c0_16, %c0_17] : memref<49x8x4xf32, #tpu.memory_space<vmem>>, vector<1x8x4xf32>
    %14 = vector.shape_cast %13 : vector<1x8x4xf32> to vector<8x4xf32>
    %c0_18 = arith.constant 0 : index
    %c0_19 = arith.constant 0 : index
    %c0_20 = arith.constant 0 : index
    %c0_21 = arith.constant 0 : index
    %c1_22 = arith.constant 1 : index
    %15 = vector.load %arg1[%c0_18, %c0_19, %c0_20, %c0_21, %c1_22] : memref<1x2x2x4x124xf32, #tpu.memory_space<vmem>>, vector<1x1x1x4x88xf32>
    %16 = vector.shape_cast %15 : vector<1x1x1x4x88xf32> to vector<4x88xf32>
    %cst_23 = arith.constant dense<0.000000e+00> : vector<8x88xf32>
    %17 = tpu.matmul %14, %16, %cst_23 {dimension_numbers = #tpu.dot_dimension_numbers<[1], [0], [0], [1], [0, 0, 1, 1], [], []>} : vector<8x4xf32>, vector<4x88xf32>, vector<8x88xf32> -> vector<8x88xf32>
    %18 = arith.addf %12, %17 : vector<8x88xf32>
    %c3 = arith.constant 3 : index
    %c0_24 = arith.constant 0 : index
    %c0_25 = arith.constant 0 : index
    %19 = vector.load %arg2[%c3, %c0_24, %c0_25] : memref<49x8x4xf32, #tpu.memory_space<vmem>>, vector<1x8x4xf32>
    %20 = vector.shape_cast %19 : vector<1x8x4xf32> to vector<8x4xf32>
    %c0_26 = arith.constant 0 : index
    %c0_27 = arith.constant 0 : index
    %c1_28 = arith.constant 1 : index
    %c0_29 = arith.constant 0 : index
    %c1_30 = arith.constant 1 : index
    %21 = vector.load %arg1[%c0_26, %c0_27, %c1_28, %c0_29, %c1_30] : memref<1x2x2x4x124xf32, #tpu.memory_space<vmem>>, vector<1x1x1x4x88xf32>
    %22 = vector.shape_cast %21 : vector<1x1x1x4x88xf32> to vector<4x88xf32>
    %cst_31 = arith.constant dense<0.000000e+00> : vector<8x88xf32>
    %23 = tpu.matmul %20, %22, %cst_31 {dimension_numbers = #tpu.dot_dimension_numbers<[1], [0], [0], [1], [0, 0, 1, 1], [], []>} : vector<8x4xf32>, vector<4x88xf32>, vector<8x88xf32> -> vector<8x88xf32>
    %24 = arith.addf %18, %23 : vector<8x88xf32>
    %c4 = arith.constant 4 : index
    %c0_32 = arith.constant 0 : index
    %c0_33 = arith.constant 0 : index
    %25 = vector.load %arg2[%c4, %c0_32, %c0_33] : memref<49x8x4xf32, #tpu.memory_space<vmem>>, vector<1x8x4xf32>
    %26 = vector.shape_cast %25 : vector<1x8x4xf32> to vector<8x4xf32>
    %c0_34 = arith.constant 0 : index
    %c0_35 = arith.constant 0 : index
    %c0_36 = arith.constant 0 : index
    %c0_37 = arith.constant 0 : index
    %c2_38 = arith.constant 2 : index
    %27 = vector.load %arg1[%c0_34, %c0_35, %c0_36, %c0_37, %c2_38] : memref<1x2x2x4x124xf32, #tpu.memory_space<vmem>>, vector<1x1x1x4x88xf32>
    %28 = vector.shape_cast %27 : vector<1x1x1x4x88xf32> to vector<4x88xf32>
    %cst_39 = arith.constant dense<0.000000e+00> : vector<8x88xf32>
    %29 = tpu.matmul %26, %28, %cst_39 {dimension_numbers = #tpu.dot_dimension_numbers<[1], [0], [0], [1], [0, 0, 1, 1], [], []>} : vector<8x4xf32>, vector<4x88xf32>, vector<8x88xf32> -> vector<8x88xf32>
    %30 = arith.addf %24, %29 : vector<8x88xf32>
    %c5 = arith.constant 5 : index
    %c0_40 = arith.constant 0 : index
    %c0_41 = arith.constant 0 : index
    %31 = vector.load %arg2[%c5, %c0_40, %c0_41] : memref<49x8x4xf32, #tpu.memory_space<vmem>>, vector<1x8x4xf32>
    %32 = vector.shape_cast %31 : vector<1x8x4xf32> to vector<8x4xf32>
    %c0_42 = arith.constant 0 : index
    %c0_43 = arith.constant 0 : index
    %c1_44 = arith.constant 1 : index
    %c0_45 = arith.constant 0 : index
    %c2_46 = arith.constant 2 : index
    %33 = vector.load %arg1[%c0_42, %c0_43, %c1_44, %c0_45, %c2_46] : memref<1x2x2x4x124xf32, #tpu.memory_space<vmem>>, vector<1x1x1x4x88xf32>
    %34 = vector.shape_cast %33 : vector<1x1x1x4x88xf32> to vector<4x88xf32>
    %cst_47 = arith.constant dense<0.000000e+00> : vector<8x88xf32>
    %35 = tpu.matmul %32, %34, %cst_47 {dimension_numbers = #tpu.dot_dimension_numbers<[1], [0], [0], [1], [0, 0, 1, 1], [], []>} : vector<8x4xf32>, vector<4x88xf32>, vector<8x88xf32> -> vector<8x88xf32>
    %36 = arith.addf %30, %35 : vector<8x88xf32>
    %c6 = arith.constant 6 : index
    %c0_48 = arith.constant 0 : index
    %c0_49 = arith.constant 0 : index
    %37 = vector.load %arg2[%c6, %c0_48, %c0_49] : memref<49x8x4xf32, #tpu.memory_space<vmem>>, vector<1x8x4xf32>
    %38 = vector.shape_cast %37 : vector<1x8x4xf32> to vector<8x4xf32>
    %c0_50 = arith.constant 0 : index
    %c0_51 = arith.constant 0 : index
    %c0_52 = arith.constant 0 : index
    %c0_53 = arith.constant 0 : index
    %c3_54 = arith.constant 3 : index
    %39 = vector.load %arg1[%c0_50, %c0_51, %c0_52, %c0_53, %c3_54] : memref<1x2x2x4x124xf32, #tpu.memory_space<vmem>>, vector<1x1x1x4x88xf32>
    %40 = vector.shape_cast %39 : vector<1x1x1x4x88xf32> to vector<4x88xf32>
    %cst_55 = arith.constant dense<0.000000e+00> : vector<8x88xf32>
    %41 = tpu.matmul %38, %40, %cst_55 {dimension_numbers = #tpu.dot_dimension_numbers<[1], [0], [0], [1], [0, 0, 1, 1], [], []>} : vector<8x4xf32>, vector<4x88xf32>, vector<8x88xf32> -> vector<8x88xf32>
    %42 = arith.addf %36, %41 : vector<8x88xf32>
    %c7 = arith.constant 7 : index
    %c0_56 = arith.constant 0 : index
    %c0_57 = arith.constant 0 : index
    %43 = vector.load %arg2[%c7, %c0_56, %c0_57] : memref<49x8x4xf32, #tpu.memory_space<vmem>>, vector<1x8x4xf32>
    %44 = vector.shape_cast %43 : vector<1x8x4xf32> to vector<8x4xf32>
    %c0_58 = arith.constant 0 : index
    %c1_59 = arith.constant 1 : index
    %c0_60 = arith.constant 0 : index
    %c0_61 = arith.constant 0 : index
    %c0_62 = arith.constant 0 : index
    %45 = vector.load %arg1[%c0_58, %c1_59, %c0_60, %c0_61, %c0_62] : memref<1x2x2x4x124xf32, #tpu.memory_space<vmem>>, vector<1x1x1x4x88xf32>
    %46 = vector.shape_cast %45 : vector<1x1x1x4x88xf32> to vector<4x88xf32>
    %cst_63 = arith.constant dense<0.000000e+00> : vector<8x88xf32>
    %47 = tpu.matmul %44, %46, %cst_63 {dimension_numbers = #tpu.dot_dimension_numbers<[1], [0], [0], [1], [0, 0, 1, 1], [], []>} : vector<8x4xf32>, vector<4x88xf32>, vector<8x88xf32> -> vector<8x88xf32>
    %48 = arith.addf %42, %47 : vector<8x88xf32>
    %c8 = arith.constant 8 : index
    %c0_64 = arith.constant 0 : index
    %c0_65 = arith.constant 0 : index
    %49 = vector.load %arg2[%c8, %c0_64, %c0_65] : memref<49x8x4xf32, #tpu.memory_space<vmem>>, vector<1x8x4xf32>
    %50 = vector.shape_cast %49 : vector<1x8x4xf32> to vector<8x4xf32>
    %c0_66 = arith.constant 0 : index
    %c1_67 = arith.constant 1 : index
    %c1_68 = arith.constant 1 : index
    %c0_69 = arith.constant 0 : index
    %c0_70 = arith.constant 0 : index
    %51 = vector.load %arg1[%c0_66, %c1_67, %c1_68, %c0_69, %c0_70] : memref<1x2x2x4x124xf32, #tpu.memory_space<vmem>>, vector<1x1x1x4x88xf32>
    %52 = vector.shape_cast %51 : vector<1x1x1x4x88xf32> to vector<4x88xf32>
    %cst_71 = arith.constant dense<0.000000e+00> : vector<8x88xf32>
    %53 = tpu.matmul %50, %52, %cst_71 {dimension_numbers = #tpu.dot_dimension_numbers<[1], [0], [0], [1], [0, 0, 1, 1], [], []>} : vector<8x4xf32>, vector<4x88xf32>, vector<8x88xf32> -> vector<8x88xf32>
    %54 = arith.addf %48, %53 : vector<8x88xf32>
    %c9 = arith.constant 9 : index
    %c0_72 = arith.constant 0 : index
    %c0_73 = arith.constant 0 : index
    %55 = vector.load %arg2[%c9, %c0_72, %c0_73] : memref<49x8x4xf32, #tpu.memory_space<vmem>>, vector<1x8x4xf32>
    %56 = vector.shape_cast %55 : vector<1x8x4xf32> to vector<8x4xf32>
    %c0_74 = arith.constant 0 : index
    %c1_75 = arith.constant 1 : index
    %c0_76 = arith.constant 0 : index
    %c0_77 = arith.constant 0 : index
    %c1_78 = arith.constant 1 : index
    %57 = vector.load %arg1[%c0_74, %c1_75, %c0_76, %c0_77, %c1_78] : memref<1x2x2x4x124xf32, #tpu.memory_space<vmem>>, vector<1x1x1x4x88xf32>
    %58 = vector.shape_cast %57 : vector<1x1x1x4x88xf32> to vector<4x88xf32>
    %cst_79 = arith.constant dense<0.000000e+00> : vector<8x88xf32>
    %59 = tpu.matmul %56, %58, %cst_79 {dimension_numbers = #tpu.dot_dimension_numbers<[1], [0], [0], [1], [0, 0, 1, 1], [], []>} : vector<8x4xf32>, vector<4x88xf32>, vector<8x88xf32> -> vector<8x88xf32>
    %60 = arith.addf %54, %59 : vector<8x88xf32>
    %c10 = arith.constant 10 : index
    %c0_80 = arith.constant 0 : index
    %c0_81 = arith.constant 0 : index
    %61 = vector.load %arg2[%c10, %c0_80, %c0_81] : memref<49x8x4xf32, #tpu.memory_space<vmem>>, vector<1x8x4xf32>
    %62 = vector.shape_cast %61 : vector<1x8x4xf32> to vector<8x4xf32>
    %c0_82 = arith.constant 0 : index
    %c1_83 = arith.constant 1 : index
    %c1_84 = arith.constant 1 : index
    %c0_85 = arith.constant 0 : index
    %c1_86 = arith.constant 1 : index
    %63 = vector.load %arg1[%c0_82, %c1_83, %c1_84, %c0_85, %c1_86] : memref<1x2x2x4x124xf32, #tpu.memory_space<vmem>>, vector<1x1x1x4x88xf32>
    %64 = vector.shape_cast %63 : vector<1x1x1x4x88xf32> to vector<4x88xf32>
    %cst_87 = arith.constant dense<0.000000e+00> : vector<8x88xf32>
    %65 = tpu.matmul %62, %64, %cst_87 {dimension_numbers = #tpu.dot_dimension_numbers<[1], [0], [0], [1], [0, 0, 1, 1], [], []>} : vector<8x4xf32>, vector<4x88xf32>, vector<8x88xf32> -> vector<8x88xf32>
    %66 = arith.addf %60, %65 : vector<8x88xf32>
    %c11 = arith.constant 11 : index
    %c0_88 = arith.constant 0 : index
    %c0_89 = arith.constant 0 : index
    %67 = vector.load %arg2[%c11, %c0_88, %c0_89] : memref<49x8x4xf32, #tpu.memory_space<vmem>>, vector<1x8x4xf32>
    %68 = vector.shape_cast %67 : vector<1x8x4xf32> to vector<8x4xf32>
    %c0_90 = arith.constant 0 : index
    %c1_91 = arith.constant 1 : index
    %c0_92 = arith.constant 0 : index
    %c0_93 = arith.constant 0 : index
    %c2_94 = arith.constant 2 : index
    %69 = vector.load %arg1[%c0_90, %c1_91, %c0_92, %c0_93, %c2_94] : memref<1x2x2x4x124xf32, #tpu.memory_space<vmem>>, vector<1x1x1x4x88xf32>
    %70 = vector.shape_cast %69 : vector<1x1x1x4x88xf32> to vector<4x88xf32>
    %cst_95 = arith.constant dense<0.000000e+00> : vector<8x88xf32>
    %71 = tpu.matmul %68, %70, %cst_95 {dimension_numbers = #tpu.dot_dimension_numbers<[1], [0], [0], [1], [0, 0, 1, 1], [], []>} : vector<8x4xf32>, vector<4x88xf32>, vector<8x88xf32> -> vector<8x88xf32>
    %72 = arith.addf %66, %71 : vector<8x88xf32>
    %c12 = arith.constant 12 : index
    %c0_96 = arith.constant 0 : index
    %c0_97 = arith.constant 0 : index
    %73 = vector.load %arg2[%c12, %c0_96, %c0_97] : memref<49x8x4xf32, #tpu.memory_space<vmem>>, vector<1x8x4xf32>
    %74 = vector.shape_cast %73 : vector<1x8x4xf32> to vector<8x4xf32>
    %c0_98 = arith.constant 0 : index
    %c1_99 = arith.constant 1 : index
    %c1_100 = arith.constant 1 : index
    %c0_101 = arith.constant 0 : index
    %c2_102 = arith.constant 2 : index
    %75 = vector.load %arg1[%c0_98, %c1_99, %c1_100, %c0_101, %c2_102] : memref<1x2x2x4x124xf32, #tpu.memory_space<vmem>>, vector<1x1x1x4x88xf32>
    %76 = vector.shape_cast %75 : vector<1x1x1x4x88xf32> to vector<4x88xf32>
    %cst_103 = arith.constant dense<0.000000e+00> : vector<8x88xf32>
    %77 = tpu.matmul %74, %76, %cst_103 {dimension_numbers = #tpu.dot_dimension_numbers<[1], [0], [0], [1], [0, 0, 1, 1], [], []>} : vector<8x4xf32>, vector<4x88xf32>, vector<8x88xf32> -> vector<8x88xf32>
    %78 = arith.addf %72, %77 : vector<8x88xf32>
    %c13 = arith.constant 13 : index
    %c0_104 = arith.constant 0 : index
    %c0_105 = arith.constant 0 : index
    %79 = vector.load %arg2[%c13, %c0_104, %c0_105] : memref<49x8x4xf32, #tpu.memory_space<vmem>>, vector<1x8x4xf32>
    %80 = vector.shape_cast %79 : vector<1x8x4xf32> to vector<8x4xf32>
    %c0_106 = arith.constant 0 : index
    %c1_107 = arith.constant 1 : index
    %c0_108 = arith.constant 0 : index
    %c0_109 = arith.constant 0 : index
    %c3_110 = arith.constant 3 : index
    %81 = vector.load %arg1[%c0_106, %c1_107, %c0_108, %c0_109, %c3_110] : memref<1x2x2x4x124xf32, #tpu.memory_space<vmem>>, vector<1x1x1x4x88xf32>
    %82 = vector.shape_cast %81 : vector<1x1x1x4x88xf32> to vector<4x88xf32>
    %cst_111 = arith.constant dense<0.000000e+00> : vector<8x88xf32>
    %83 = tpu.matmul %80, %82, %cst_111 {dimension_numbers = #tpu.dot_dimension_numbers<[1], [0], [0], [1], [0, 0, 1, 1], [], []>} : vector<8x4xf32>, vector<4x88xf32>, vector<8x88xf32> -> vector<8x88xf32>
    %84 = arith.addf %78, %83 : vector<8x88xf32>
    %c14 = arith.constant 14 : index
    %c0_112 = arith.constant 0 : index
    %c0_113 = arith.constant 0 : index
    %85 = vector.load %arg2[%c14, %c0_112, %c0_113] : memref<49x8x4xf32, #tpu.memory_space<vmem>>, vector<1x8x4xf32>
    %86 = vector.shape_cast %85 : vector<1x8x4xf32> to vector<8x4xf32>
    %c0_114 = arith.constant 0 : index
    %c0_115 = arith.constant 0 : index
    %c0_116 = arith.constant 0 : index
    %c0_117 = arith.constant 0 : index
    %c11_118 = arith.constant 11 : index
    %87 = vector.load %arg1[%c0_114, %c0_115, %c0_116, %c0_117, %c11_118] : memref<1x2x2x4x124xf32, #tpu.memory_space<vmem>>, vector<1x1x1x4x88xf32>
    %88 = vector.shape_cast %87 : vector<1x1x1x4x88xf32> to vector<4x88xf32>
    %cst_119 = arith.constant dense<0.000000e+00> : vector<8x88xf32>
    %89 = tpu.matmul %86, %88, %cst_119 {dimension_numbers = #tpu.dot_dimension_numbers<[1], [0], [0], [1], [0, 0, 1, 1], [], []>} : vector<8x4xf32>, vector<4x88xf32>, vector<8x88xf32> -> vector<8x88xf32>
    %90 = arith.addf %84, %89 : vector<8x88xf32>
    %c15 = arith.constant 15 : index
    %c0_120 = arith.constant 0 : index
    %c0_121 = arith.constant 0 : index
    %91 = vector.load %arg2[%c15, %c0_120, %c0_121] : memref<49x8x4xf32, #tpu.memory_space<vmem>>, vector<1x8x4xf32>
    %92 = vector.shape_cast %91 : vector<1x8x4xf32> to vector<8x4xf32>
    %c0_122 = arith.constant 0 : index
    %c0_123 = arith.constant 0 : index
    %c1_124 = arith.constant 1 : index
    %c0_125 = arith.constant 0 : index
    %c11_126 = arith.constant 11 : index
    %93 = vector.load %arg1[%c0_122, %c0_123, %c1_124, %c0_125, %c11_126] : memref<1x2x2x4x124xf32, #tpu.memory_space<vmem>>, vector<1x1x1x4x88xf32>
    %94 = vector.shape_cast %93 : vector<1x1x1x4x88xf32> to vector<4x88xf32>
    %cst_127 = arith.constant dense<0.000000e+00> : vector<8x88xf32>
    %95 = tpu.matmul %92, %94, %cst_127 {dimension_numbers = #tpu.dot_dimension_numbers<[1], [0], [0], [1], [0, 0, 1, 1], [], []>} : vector<8x4xf32>, vector<4x88xf32>, vector<8x88xf32> -> vector<8x88xf32>
    %96 = arith.addf %90, %95 : vector<8x88xf32>
    %c16 = arith.constant 16 : index
    %c0_128 = arith.constant 0 : index
    %c0_129 = arith.constant 0 : index
    %97 = vector.load %arg2[%c16, %c0_128, %c0_129] : memref<49x8x4xf32, #tpu.memory_space<vmem>>, vector<1x8x4xf32>
    %98 = vector.shape_cast %97 : vector<1x8x4xf32> to vector<8x4xf32>
    %c0_130 = arith.constant 0 : index
    %c0_131 = arith.constant 0 : index
    %c0_132 = arith.constant 0 : index
    %c0_133 = arith.constant 0 : index
    %c12_134 = arith.constant 12 : index
    %99 = vector.load %arg1[%c0_130, %c0_131, %c0_132, %c0_133, %c12_134] : memref<1x2x2x4x124xf32, #tpu.memory_space<vmem>>, vector<1x1x1x4x88xf32>
    %100 = vector.shape_cast %99 : vector<1x1x1x4x88xf32> to vector<4x88xf32>
    %cst_135 = arith.constant dense<0.000000e+00> : vector<8x88xf32>
    %101 = tpu.matmul %98, %100, %cst_135 {dimension_numbers = #tpu.dot_dimension_numbers<[1], [0], [0], [1], [0, 0, 1, 1], [], []>} : vector<8x4xf32>, vector<4x88xf32>, vector<8x88xf32> -> vector<8x88xf32>
    %102 = arith.addf %96, %101 : vector<8x88xf32>
    %c17 = arith.constant 17 : index
    %c0_136 = arith.constant 0 : index
    %c0_137 = arith.constant 0 : index
    %103 = vector.load %arg2[%c17, %c0_136, %c0_137] : memref<49x8x4xf32, #tpu.memory_space<vmem>>, vector<1x8x4xf32>
    %104 = vector.shape_cast %103 : vector<1x8x4xf32> to vector<8x4xf32>
    %c0_138 = arith.constant 0 : index
    %c0_139 = arith.constant 0 : index
    %c1_140 = arith.constant 1 : index
    %c0_141 = arith.constant 0 : index
    %c12_142 = arith.constant 12 : index
    %105 = vector.load %arg1[%c0_138, %c0_139, %c1_140, %c0_141, %c12_142] : memref<1x2x2x4x124xf32, #tpu.memory_space<vmem>>, vector<1x1x1x4x88xf32>
    %106 = vector.shape_cast %105 : vector<1x1x1x4x88xf32> to vector<4x88xf32>
    %cst_143 = arith.constant dense<0.000000e+00> : vector<8x88xf32>
    %107 = tpu.matmul %104, %106, %cst_143 {dimension_numbers = #tpu.dot_dimension_numbers<[1], [0], [0], [1], [0, 0, 1, 1], [], []>} : vector<8x4xf32>, vector<4x88xf32>, vector<8x88xf32> -> vector<8x88xf32>
    %108 = arith.addf %102, %107 : vector<8x88xf32>
    %c18 = arith.constant 18 : index
    %c0_144 = arith.constant 0 : index
    %c0_145 = arith.constant 0 : index
    %109 = vector.load %arg2[%c18, %c0_144, %c0_145] : memref<49x8x4xf32, #tpu.memory_space<vmem>>, vector<1x8x4xf32>
    %110 = vector.shape_cast %109 : vector<1x8x4xf32> to vector<8x4xf32>
    %c0_146 = arith.constant 0 : index
    %c0_147 = arith.constant 0 : index
    %c0_148 = arith.constant 0 : index
    %c0_149 = arith.constant 0 : index
    %c13_150 = arith.constant 13 : index
    %111 = vector.load %arg1[%c0_146, %c0_147, %c0_148, %c0_149, %c13_150] : memref<1x2x2x4x124xf32, #tpu.memory_space<vmem>>, vector<1x1x1x4x88xf32>
    %112 = vector.shape_cast %111 : vector<1x1x1x4x88xf32> to vector<4x88xf32>
    %cst_151 = arith.constant dense<0.000000e+00> : vector<8x88xf32>
    %113 = tpu.matmul %110, %112, %cst_151 {dimension_numbers = #tpu.dot_dimension_numbers<[1], [0], [0], [1], [0, 0, 1, 1], [], []>} : vector<8x4xf32>, vector<4x88xf32>, vector<8x88xf32> -> vector<8x88xf32>
    %114 = arith.addf %108, %113 : vector<8x88xf32>
    %c19 = arith.constant 19 : index
    %c0_152 = arith.constant 0 : index
    %c0_153 = arith.constant 0 : index
    %115 = vector.load %arg2[%c19, %c0_152, %c0_153] : memref<49x8x4xf32, #tpu.memory_space<vmem>>, vector<1x8x4xf32>
    %116 = vector.shape_cast %115 : vector<1x8x4xf32> to vector<8x4xf32>
    %c0_154 = arith.constant 0 : index
    %c0_155 = arith.constant 0 : index
    %c1_156 = arith.constant 1 : index
    %c0_157 = arith.constant 0 : index
    %c13_158 = arith.constant 13 : index
    %117 = vector.load %arg1[%c0_154, %c0_155, %c1_156, %c0_157, %c13_158] : memref<1x2x2x4x124xf32, #tpu.memory_space<vmem>>, vector<1x1x1x4x88xf32>
    %118 = vector.shape_cast %117 : vector<1x1x1x4x88xf32> to vector<4x88xf32>
    %cst_159 = arith.constant dense<0.000000e+00> : vector<8x88xf32>
    %119 = tpu.matmul %116, %118, %cst_159 {dimension_numbers = #tpu.dot_dimension_numbers<[1], [0], [0], [1], [0, 0, 1, 1], [], []>} : vector<8x4xf32>, vector<4x88xf32>, vector<8x88xf32> -> vector<8x88xf32>
    %120 = arith.addf %114, %119 : vector<8x88xf32>
    %c20 = arith.constant 20 : index
    %c0_160 = arith.constant 0 : index
    %c0_161 = arith.constant 0 : index
    %121 = vector.load %arg2[%c20, %c0_160, %c0_161] : memref<49x8x4xf32, #tpu.memory_space<vmem>>, vector<1x8x4xf32>
    %122 = vector.shape_cast %121 : vector<1x8x4xf32> to vector<8x4xf32>
    %c0_162 = arith.constant 0 : index
    %c0_163 = arith.constant 0 : index
    %c0_164 = arith.constant 0 : index
    %c0_165 = arith.constant 0 : index
    %c14_166 = arith.constant 14 : index
    %123 = vector.load %arg1[%c0_162, %c0_163, %c0_164, %c0_165, %c14_166] : memref<1x2x2x4x124xf32, #tpu.memory_space<vmem>>, vector<1x1x1x4x88xf32>
    %124 = vector.shape_cast %123 : vector<1x1x1x4x88xf32> to vector<4x88xf32>
    %cst_167 = arith.constant dense<0.000000e+00> : vector<8x88xf32>
    %125 = tpu.matmul %122, %124, %cst_167 {dimension_numbers = #tpu.dot_dimension_numbers<[1], [0], [0], [1], [0, 0, 1, 1], [], []>} : vector<8x4xf32>, vector<4x88xf32>, vector<8x88xf32> -> vector<8x88xf32>
    %126 = arith.addf %120, %125 : vector<8x88xf32>
    %c21 = arith.constant 21 : index
    %c0_168 = arith.constant 0 : index
    %c0_169 = arith.constant 0 : index
    %127 = vector.load %arg2[%c21, %c0_168, %c0_169] : memref<49x8x4xf32, #tpu.memory_space<vmem>>, vector<1x8x4xf32>
    %128 = vector.shape_cast %127 : vector<1x8x4xf32> to vector<8x4xf32>
    %c0_170 = arith.constant 0 : index
    %c1_171 = arith.constant 1 : index
    %c0_172 = arith.constant 0 : index
    %c0_173 = arith.constant 0 : index
    %c11_174 = arith.constant 11 : index
    %129 = vector.load %arg1[%c0_170, %c1_171, %c0_172, %c0_173, %c11_174] : memref<1x2x2x4x124xf32, #tpu.memory_space<vmem>>, vector<1x1x1x4x88xf32>
    %130 = vector.shape_cast %129 : vector<1x1x1x4x88xf32> to vector<4x88xf32>
    %cst_175 = arith.constant dense<0.000000e+00> : vector<8x88xf32>
    %131 = tpu.matmul %128, %130, %cst_175 {dimension_numbers = #tpu.dot_dimension_numbers<[1], [0], [0], [1], [0, 0, 1, 1], [], []>} : vector<8x4xf32>, vector<4x88xf32>, vector<8x88xf32> -> vector<8x88xf32>
    %132 = arith.addf %126, %131 : vector<8x88xf32>
    %c22 = arith.constant 22 : index
    %c0_176 = arith.constant 0 : index
    %c0_177 = arith.constant 0 : index
    %133 = vector.load %arg2[%c22, %c0_176, %c0_177] : memref<49x8x4xf32, #tpu.memory_space<vmem>>, vector<1x8x4xf32>
    %134 = vector.shape_cast %133 : vector<1x8x4xf32> to vector<8x4xf32>
    %c0_178 = arith.constant 0 : index
    %c1_179 = arith.constant 1 : index
    %c1_180 = arith.constant 1 : index
    %c0_181 = arith.constant 0 : index
    %c11_182 = arith.constant 11 : index
    %135 = vector.load %arg1[%c0_178, %c1_179, %c1_180, %c0_181, %c11_182] : memref<1x2x2x4x124xf32, #tpu.memory_space<vmem>>, vector<1x1x1x4x88xf32>
    %136 = vector.shape_cast %135 : vector<1x1x1x4x88xf32> to vector<4x88xf32>
    %cst_183 = arith.constant dense<0.000000e+00> : vector<8x88xf32>
    %137 = tpu.matmul %134, %136, %cst_183 {dimension_numbers = #tpu.dot_dimension_numbers<[1], [0], [0], [1], [0, 0, 1, 1], [], []>} : vector<8x4xf32>, vector<4x88xf32>, vector<8x88xf32> -> vector<8x88xf32>
    %138 = arith.addf %132, %137 : vector<8x88xf32>
    %c23 = arith.constant 23 : index
    %c0_184 = arith.constant 0 : index
    %c0_185 = arith.constant 0 : index
    %139 = vector.load %arg2[%c23, %c0_184, %c0_185] : memref<49x8x4xf32, #tpu.memory_space<vmem>>, vector<1x8x4xf32>
    %140 = vector.shape_cast %139 : vector<1x8x4xf32> to vector<8x4xf32>
    %c0_186 = arith.constant 0 : index
    %c1_187 = arith.constant 1 : index
    %c0_188 = arith.constant 0 : index
    %c0_189 = arith.constant 0 : index
    %c12_190 = arith.constant 12 : index
    %141 = vector.load %arg1[%c0_186, %c1_187, %c0_188, %c0_189, %c12_190] : memref<1x2x2x4x124xf32, #tpu.memory_space<vmem>>, vector<1x1x1x4x88xf32>
    %142 = vector.shape_cast %141 : vector<1x1x1x4x88xf32> to vector<4x88xf32>
    %cst_191 = arith.constant dense<0.000000e+00> : vector<8x88xf32>
    %143 = tpu.matmul %140, %142, %cst_191 {dimension_numbers = #tpu.dot_dimension_numbers<[1], [0], [0], [1], [0, 0, 1, 1], [], []>} : vector<8x4xf32>, vector<4x88xf32>, vector<8x88xf32> -> vector<8x88xf32>
    %144 = arith.addf %138, %143 : vector<8x88xf32>
    %c24 = arith.constant 24 : index
    %c0_192 = arith.constant 0 : index
    %c0_193 = arith.constant 0 : index
    %145 = vector.load %arg2[%c24, %c0_192, %c0_193] : memref<49x8x4xf32, #tpu.memory_space<vmem>>, vector<1x8x4xf32>
    %146 = vector.shape_cast %145 : vector<1x8x4xf32> to vector<8x4xf32>
    %c0_194 = arith.constant 0 : index
    %c1_195 = arith.constant 1 : index
    %c1_196 = arith.constant 1 : index
    %c0_197 = arith.constant 0 : index
    %c12_198 = arith.constant 12 : index
    %147 = vector.load %arg1[%c0_194, %c1_195, %c1_196, %c0_197, %c12_198] : memref<1x2x2x4x124xf32, #tpu.memory_space<vmem>>, vector<1x1x1x4x88xf32>
    %148 = vector.shape_cast %147 : vector<1x1x1x4x88xf32> to vector<4x88xf32>
    %cst_199 = arith.constant dense<0.000000e+00> : vector<8x88xf32>
    %149 = tpu.matmul %146, %148, %cst_199 {dimension_numbers = #tpu.dot_dimension_numbers<[1], [0], [0], [1], [0, 0, 1, 1], [], []>} : vector<8x4xf32>, vector<4x88xf32>, vector<8x88xf32> -> vector<8x88xf32>
    %150 = arith.addf %144, %149 : vector<8x88xf32>
    %c25 = arith.constant 25 : index
    %c0_200 = arith.constant 0 : index
    %c0_201 = arith.constant 0 : index
    %151 = vector.load %arg2[%c25, %c0_200, %c0_201] : memref<49x8x4xf32, #tpu.memory_space<vmem>>, vector<1x8x4xf32>
    %152 = vector.shape_cast %151 : vector<1x8x4xf32> to vector<8x4xf32>
    %c0_202 = arith.constant 0 : index
    %c1_203 = arith.constant 1 : index
    %c0_204 = arith.constant 0 : index
    %c0_205 = arith.constant 0 : index
    %c13_206 = arith.constant 13 : index
    %153 = vector.load %arg1[%c0_202, %c1_203, %c0_204, %c0_205, %c13_206] : memref<1x2x2x4x124xf32, #tpu.memory_space<vmem>>, vector<1x1x1x4x88xf32>
    %154 = vector.shape_cast %153 : vector<1x1x1x4x88xf32> to vector<4x88xf32>
    %cst_207 = arith.constant dense<0.000000e+00> : vector<8x88xf32>
    %155 = tpu.matmul %152, %154, %cst_207 {dimension_numbers = #tpu.dot_dimension_numbers<[1], [0], [0], [1], [0, 0, 1, 1], [], []>} : vector<8x4xf32>, vector<4x88xf32>, vector<8x88xf32> -> vector<8x88xf32>
    %156 = arith.addf %150, %155 : vector<8x88xf32>
    %c26 = arith.constant 26 : index
    %c0_208 = arith.constant 0 : index
    %c0_209 = arith.constant 0 : index
    %157 = vector.load %arg2[%c26, %c0_208, %c0_209] : memref<49x8x4xf32, #tpu.memory_space<vmem>>, vector<1x8x4xf32>
    %158 = vector.shape_cast %157 : vector<1x8x4xf32> to vector<8x4xf32>
    %c0_210 = arith.constant 0 : index
    %c1_211 = arith.constant 1 : index
    %c1_212 = arith.constant 1 : index
    %c0_213 = arith.constant 0 : index
    %c13_214 = arith.constant 13 : index
    %159 = vector.load %arg1[%c0_210, %c1_211, %c1_212, %c0_213, %c13_214] : memref<1x2x2x4x124xf32, #tpu.memory_space<vmem>>, vector<1x1x1x4x88xf32>
    %160 = vector.shape_cast %159 : vector<1x1x1x4x88xf32> to vector<4x88xf32>
    %cst_215 = arith.constant dense<0.000000e+00> : vector<8x88xf32>
    %161 = tpu.matmul %158, %160, %cst_215 {dimension_numbers = #tpu.dot_dimension_numbers<[1], [0], [0], [1], [0, 0, 1, 1], [], []>} : vector<8x4xf32>, vector<4x88xf32>, vector<8x88xf32> -> vector<8x88xf32>
    %162 = arith.addf %156, %161 : vector<8x88xf32>
    %c27 = arith.constant 27 : index
    %c0_216 = arith.constant 0 : index
    %c0_217 = arith.constant 0 : index
    %163 = vector.load %arg2[%c27, %c0_216, %c0_217] : memref<49x8x4xf32, #tpu.memory_space<vmem>>, vector<1x8x4xf32>
    %164 = vector.shape_cast %163 : vector<1x8x4xf32> to vector<8x4xf32>
    %c0_218 = arith.constant 0 : index
    %c1_219 = arith.constant 1 : index
    %c0_220 = arith.constant 0 : index
    %c0_221 = arith.constant 0 : index
    %c14_222 = arith.constant 14 : index
    %165 = vector.load %arg1[%c0_218, %c1_219, %c0_220, %c0_221, %c14_222] : memref<1x2x2x4x124xf32, #tpu.memory_space<vmem>>, vector<1x1x1x4x88xf32>
    %166 = vector.shape_cast %165 : vector<1x1x1x4x88xf32> to vector<4x88xf32>
    %cst_223 = arith.constant dense<0.000000e+00> : vector<8x88xf32>
    %167 = tpu.matmul %164, %166, %cst_223 {dimension_numbers = #tpu.dot_dimension_numbers<[1], [0], [0], [1], [0, 0, 1, 1], [], []>} : vector<8x4xf32>, vector<4x88xf32>, vector<8x88xf32> -> vector<8x88xf32>
    %168 = arith.addf %162, %167 : vector<8x88xf32>
    %c28 = arith.constant 28 : index
    %c0_224 = arith.constant 0 : index
    %c0_225 = arith.constant 0 : index
    %169 = vector.load %arg2[%c28, %c0_224, %c0_225] : memref<49x8x4xf32, #tpu.memory_space<vmem>>, vector<1x8x4xf32>
    %170 = vector.shape_cast %169 : vector<1x8x4xf32> to vector<8x4xf32>
    %c0_226 = arith.constant 0 : index
    %c0_227 = arith.constant 0 : index
    %c0_228 = arith.constant 0 : index
    %c0_229 = arith.constant 0 : index
    %c22_230 = arith.constant 22 : index
    %171 = vector.load %arg1[%c0_226, %c0_227, %c0_228, %c0_229, %c22_230] : memref<1x2x2x4x124xf32, #tpu.memory_space<vmem>>, vector<1x1x1x4x88xf32>
    %172 = vector.shape_cast %171 : vector<1x1x1x4x88xf32> to vector<4x88xf32>
    %cst_231 = arith.constant dense<0.000000e+00> : vector<8x88xf32>
    %173 = tpu.matmul %170, %172, %cst_231 {dimension_numbers = #tpu.dot_dimension_numbers<[1], [0], [0], [1], [0, 0, 1, 1], [], []>} : vector<8x4xf32>, vector<4x88xf32>, vector<8x88xf32> -> vector<8x88xf32>
    %174 = arith.addf %168, %173 : vector<8x88xf32>
    %c29 = arith.constant 29 : index
    %c0_232 = arith.constant 0 : index
    %c0_233 = arith.constant 0 : index
    %175 = vector.load %arg2[%c29, %c0_232, %c0_233] : memref<49x8x4xf32, #tpu.memory_space<vmem>>, vector<1x8x4xf32>
    %176 = vector.shape_cast %175 : vector<1x8x4xf32> to vector<8x4xf32>
    %c0_234 = arith.constant 0 : index
    %c0_235 = arith.constant 0 : index
    %c1_236 = arith.constant 1 : index
    %c0_237 = arith.constant 0 : index
    %c22_238 = arith.constant 22 : index
    %177 = vector.load %arg1[%c0_234, %c0_235, %c1_236, %c0_237, %c22_238] : memref<1x2x2x4x124xf32, #tpu.memory_space<vmem>>, vector<1x1x1x4x88xf32>
    %178 = vector.shape_cast %177 : vector<1x1x1x4x88xf32> to vector<4x88xf32>
    %cst_239 = arith.constant dense<0.000000e+00> : vector<8x88xf32>
    %179 = tpu.matmul %176, %178, %cst_239 {dimension_numbers = #tpu.dot_dimension_numbers<[1], [0], [0], [1], [0, 0, 1, 1], [], []>} : vector<8x4xf32>, vector<4x88xf32>, vector<8x88xf32> -> vector<8x88xf32>
    %180 = arith.addf %174, %179 : vector<8x88xf32>
    %c30 = arith.constant 30 : index
    %c0_240 = arith.constant 0 : index
    %c0_241 = arith.constant 0 : index
    %181 = vector.load %arg2[%c30, %c0_240, %c0_241] : memref<49x8x4xf32, #tpu.memory_space<vmem>>, vector<1x8x4xf32>
    %182 = vector.shape_cast %181 : vector<1x8x4xf32> to vector<8x4xf32>
    %c0_242 = arith.constant 0 : index
    %c0_243 = arith.constant 0 : index
    %c0_244 = arith.constant 0 : index
    %c0_245 = arith.constant 0 : index
    %c23_246 = arith.constant 23 : index
    %183 = vector.load %arg1[%c0_242, %c0_243, %c0_244, %c0_245, %c23_246] : memref<1x2x2x4x124xf32, #tpu.memory_space<vmem>>, vector<1x1x1x4x88xf32>
    %184 = vector.shape_cast %183 : vector<1x1x1x4x88xf32> to vector<4x88xf32>
    %cst_247 = arith.constant dense<0.000000e+00> : vector<8x88xf32>
    %185 = tpu.matmul %182, %184, %cst_247 {dimension_numbers = #tpu.dot_dimension_numbers<[1], [0], [0], [1], [0, 0, 1, 1], [], []>} : vector<8x4xf32>, vector<4x88xf32>, vector<8x88xf32> -> vector<8x88xf32>
    %186 = arith.addf %180, %185 : vector<8x88xf32>
    %c31 = arith.constant 31 : index
    %c0_248 = arith.constant 0 : index
    %c0_249 = arith.constant 0 : index
    %187 = vector.load %arg2[%c31, %c0_248, %c0_249] : memref<49x8x4xf32, #tpu.memory_space<vmem>>, vector<1x8x4xf32>
    %188 = vector.shape_cast %187 : vector<1x8x4xf32> to vector<8x4xf32>
    %c0_250 = arith.constant 0 : index
    %c0_251 = arith.constant 0 : index
    %c1_252 = arith.constant 1 : index
    %c0_253 = arith.constant 0 : index
    %c23_254 = arith.constant 23 : index
    %189 = vector.load %arg1[%c0_250, %c0_251, %c1_252, %c0_253, %c23_254] : memref<1x2x2x4x124xf32, #tpu.memory_space<vmem>>, vector<1x1x1x4x88xf32>
    %190 = vector.shape_cast %189 : vector<1x1x1x4x88xf32> to vector<4x88xf32>
    %cst_255 = arith.constant dense<0.000000e+00> : vector<8x88xf32>
    %191 = tpu.matmul %188, %190, %cst_255 {dimension_numbers = #tpu.dot_dimension_numbers<[1], [0], [0], [1], [0, 0, 1, 1], [], []>} : vector<8x4xf32>, vector<4x88xf32>, vector<8x88xf32> -> vector<8x88xf32>
    %192 = arith.addf %186, %191 : vector<8x88xf32>
    %c32 = arith.constant 32 : index
    %c0_256 = arith.constant 0 : index
    %c0_257 = arith.constant 0 : index
    %193 = vector.load %arg2[%c32, %c0_256, %c0_257] : memref<49x8x4xf32, #tpu.memory_space<vmem>>, vector<1x8x4xf32>
    %194 = vector.shape_cast %193 : vector<1x8x4xf32> to vector<8x4xf32>
    %c0_258 = arith.constant 0 : index
    %c0_259 = arith.constant 0 : index
    %c0_260 = arith.constant 0 : index
    %c0_261 = arith.constant 0 : index
    %c24_262 = arith.constant 24 : index
    %195 = vector.load %arg1[%c0_258, %c0_259, %c0_260, %c0_261, %c24_262] : memref<1x2x2x4x124xf32, #tpu.memory_space<vmem>>, vector<1x1x1x4x88xf32>
    %196 = vector.shape_cast %195 : vector<1x1x1x4x88xf32> to vector<4x88xf32>
    %cst_263 = arith.constant dense<0.000000e+00> : vector<8x88xf32>
    %197 = tpu.matmul %194, %196, %cst_263 {dimension_numbers = #tpu.dot_dimension_numbers<[1], [0], [0], [1], [0, 0, 1, 1], [], []>} : vector<8x4xf32>, vector<4x88xf32>, vector<8x88xf32> -> vector<8x88xf32>
    %198 = arith.addf %192, %197 : vector<8x88xf32>
    %c33 = arith.constant 33 : index
    %c0_264 = arith.constant 0 : index
    %c0_265 = arith.constant 0 : index
    %199 = vector.load %arg2[%c33, %c0_264, %c0_265] : memref<49x8x4xf32, #tpu.memory_space<vmem>>, vector<1x8x4xf32>
    %200 = vector.shape_cast %199 : vector<1x8x4xf32> to vector<8x4xf32>
    %c0_266 = arith.constant 0 : index
    %c0_267 = arith.constant 0 : index
    %c1_268 = arith.constant 1 : index
    %c0_269 = arith.constant 0 : index
    %c24_270 = arith.constant 24 : index
    %201 = vector.load %arg1[%c0_266, %c0_267, %c1_268, %c0_269, %c24_270] : memref<1x2x2x4x124xf32, #tpu.memory_space<vmem>>, vector<1x1x1x4x88xf32>
    %202 = vector.shape_cast %201 : vector<1x1x1x4x88xf32> to vector<4x88xf32>
    %cst_271 = arith.constant dense<0.000000e+00> : vector<8x88xf32>
    %203 = tpu.matmul %200, %202, %cst_271 {dimension_numbers = #tpu.dot_dimension_numbers<[1], [0], [0], [1], [0, 0, 1, 1], [], []>} : vector<8x4xf32>, vector<4x88xf32>, vector<8x88xf32> -> vector<8x88xf32>
    %204 = arith.addf %198, %203 : vector<8x88xf32>
    %c34 = arith.constant 34 : index
    %c0_272 = arith.constant 0 : index
    %c0_273 = arith.constant 0 : index
    %205 = vector.load %arg2[%c34, %c0_272, %c0_273] : memref<49x8x4xf32, #tpu.memory_space<vmem>>, vector<1x8x4xf32>
    %206 = vector.shape_cast %205 : vector<1x8x4xf32> to vector<8x4xf32>
    %c0_274 = arith.constant 0 : index
    %c0_275 = arith.constant 0 : index
    %c0_276 = arith.constant 0 : index
    %c0_277 = arith.constant 0 : index
    %c25_278 = arith.constant 25 : index
    %207 = vector.load %arg1[%c0_274, %c0_275, %c0_276, %c0_277, %c25_278] : memref<1x2x2x4x124xf32, #tpu.memory_space<vmem>>, vector<1x1x1x4x88xf32>
    %208 = vector.shape_cast %207 : vector<1x1x1x4x88xf32> to vector<4x88xf32>
    %cst_279 = arith.constant dense<0.000000e+00> : vector<8x88xf32>
    %209 = tpu.matmul %206, %208, %cst_279 {dimension_numbers = #tpu.dot_dimension_numbers<[1], [0], [0], [1], [0, 0, 1, 1], [], []>} : vector<8x4xf32>, vector<4x88xf32>, vector<8x88xf32> -> vector<8x88xf32>
    %210 = arith.addf %204, %209 : vector<8x88xf32>
    %c35 = arith.constant 35 : index
    %c0_280 = arith.constant 0 : index
    %c0_281 = arith.constant 0 : index
    %211 = vector.load %arg2[%c35, %c0_280, %c0_281] : memref<49x8x4xf32, #tpu.memory_space<vmem>>, vector<1x8x4xf32>
    %212 = vector.shape_cast %211 : vector<1x8x4xf32> to vector<8x4xf32>
    %c0_282 = arith.constant 0 : index
    %c1_283 = arith.constant 1 : index
    %c0_284 = arith.constant 0 : index
    %c0_285 = arith.constant 0 : index
    %c22_286 = arith.constant 22 : index
    %213 = vector.load %arg1[%c0_282, %c1_283, %c0_284, %c0_285, %c22_286] : memref<1x2x2x4x124xf32, #tpu.memory_space<vmem>>, vector<1x1x1x4x88xf32>
    %214 = vector.shape_cast %213 : vector<1x1x1x4x88xf32> to vector<4x88xf32>
    %cst_287 = arith.constant dense<0.000000e+00> : vector<8x88xf32>
    %215 = tpu.matmul %212, %214, %cst_287 {dimension_numbers = #tpu.dot_dimension_numbers<[1], [0], [0], [1], [0, 0, 1, 1], [], []>} : vector<8x4xf32>, vector<4x88xf32>, vector<8x88xf32> -> vector<8x88xf32>
    %216 = arith.addf %210, %215 : vector<8x88xf32>
    %c36 = arith.constant 36 : index
    %c0_288 = arith.constant 0 : index
    %c0_289 = arith.constant 0 : index
    %217 = vector.load %arg2[%c36, %c0_288, %c0_289] : memref<49x8x4xf32, #tpu.memory_space<vmem>>, vector<1x8x4xf32>
    %218 = vector.shape_cast %217 : vector<1x8x4xf32> to vector<8x4xf32>
    %c0_290 = arith.constant 0 : index
    %c1_291 = arith.constant 1 : index
    %c1_292 = arith.constant 1 : index
    %c0_293 = arith.constant 0 : index
    %c22_294 = arith.constant 22 : index
    %219 = vector.load %arg1[%c0_290, %c1_291, %c1_292, %c0_293, %c22_294] : memref<1x2x2x4x124xf32, #tpu.memory_space<vmem>>, vector<1x1x1x4x88xf32>
    %220 = vector.shape_cast %219 : vector<1x1x1x4x88xf32> to vector<4x88xf32>
    %cst_295 = arith.constant dense<0.000000e+00> : vector<8x88xf32>
    %221 = tpu.matmul %218, %220, %cst_295 {dimension_numbers = #tpu.dot_dimension_numbers<[1], [0], [0], [1], [0, 0, 1, 1], [], []>} : vector<8x4xf32>, vector<4x88xf32>, vector<8x88xf32> -> vector<8x88xf32>
    %222 = arith.addf %216, %221 : vector<8x88xf32>
    %c37 = arith.constant 37 : index
    %c0_296 = arith.constant 0 : index
    %c0_297 = arith.constant 0 : index
    %223 = vector.load %arg2[%c37, %c0_296, %c0_297] : memref<49x8x4xf32, #tpu.memory_space<vmem>>, vector<1x8x4xf32>
    %224 = vector.shape_cast %223 : vector<1x8x4xf32> to vector<8x4xf32>
    %c0_298 = arith.constant 0 : index
    %c1_299 = arith.constant 1 : index
    %c0_300 = arith.constant 0 : index
    %c0_301 = arith.constant 0 : index
    %c23_302 = arith.constant 23 : index
    %225 = vector.load %arg1[%c0_298, %c1_299, %c0_300, %c0_301, %c23_302] : memref<1x2x2x4x124xf32, #tpu.memory_space<vmem>>, vector<1x1x1x4x88xf32>
    %226 = vector.shape_cast %225 : vector<1x1x1x4x88xf32> to vector<4x88xf32>
    %cst_303 = arith.constant dense<0.000000e+00> : vector<8x88xf32>
    %227 = tpu.matmul %224, %226, %cst_303 {dimension_numbers = #tpu.dot_dimension_numbers<[1], [0], [0], [1], [0, 0, 1, 1], [], []>} : vector<8x4xf32>, vector<4x88xf32>, vector<8x88xf32> -> vector<8x88xf32>
    %228 = arith.addf %222, %227 : vector<8x88xf32>
    %c38 = arith.constant 38 : index
    %c0_304 = arith.constant 0 : index
    %c0_305 = arith.constant 0 : index
    %229 = vector.load %arg2[%c38, %c0_304, %c0_305] : memref<49x8x4xf32, #tpu.memory_space<vmem>>, vector<1x8x4xf32>
    %230 = vector.shape_cast %229 : vector<1x8x4xf32> to vector<8x4xf32>
    %c0_306 = arith.constant 0 : index
    %c1_307 = arith.constant 1 : index
    %c1_308 = arith.constant 1 : index
    %c0_309 = arith.constant 0 : index
    %c23_310 = arith.constant 23 : index
    %231 = vector.load %arg1[%c0_306, %c1_307, %c1_308, %c0_309, %c23_310] : memref<1x2x2x4x124xf32, #tpu.memory_space<vmem>>, vector<1x1x1x4x88xf32>
    %232 = vector.shape_cast %231 : vector<1x1x1x4x88xf32> to vector<4x88xf32>
    %cst_311 = arith.constant dense<0.000000e+00> : vector<8x88xf32>
    %233 = tpu.matmul %230, %232, %cst_311 {dimension_numbers = #tpu.dot_dimension_numbers<[1], [0], [0], [1], [0, 0, 1, 1], [], []>} : vector<8x4xf32>, vector<4x88xf32>, vector<8x88xf32> -> vector<8x88xf32>
    %234 = arith.addf %228, %233 : vector<8x88xf32>
    %c39 = arith.constant 39 : index
    %c0_312 = arith.constant 0 : index
    %c0_313 = arith.constant 0 : index
    %235 = vector.load %arg2[%c39, %c0_312, %c0_313] : memref<49x8x4xf32, #tpu.memory_space<vmem>>, vector<1x8x4xf32>
    %236 = vector.shape_cast %235 : vector<1x8x4xf32> to vector<8x4xf32>
    %c0_314 = arith.constant 0 : index
    %c1_315 = arith.constant 1 : index
    %c0_316 = arith.constant 0 : index
    %c0_317 = arith.constant 0 : index
    %c24_318 = arith.constant 24 : index
    %237 = vector.load %arg1[%c0_314, %c1_315, %c0_316, %c0_317, %c24_318] : memref<1x2x2x4x124xf32, #tpu.memory_space<vmem>>, vector<1x1x1x4x88xf32>
    %238 = vector.shape_cast %237 : vector<1x1x1x4x88xf32> to vector<4x88xf32>
    %cst_319 = arith.constant dense<0.000000e+00> : vector<8x88xf32>
    %239 = tpu.matmul %236, %238, %cst_319 {dimension_numbers = #tpu.dot_dimension_numbers<[1], [0], [0], [1], [0, 0, 1, 1], [], []>} : vector<8x4xf32>, vector<4x88xf32>, vector<8x88xf32> -> vector<8x88xf32>
    %240 = arith.addf %234, %239 : vector<8x88xf32>
    %c40 = arith.constant 40 : index
    %c0_320 = arith.constant 0 : index
    %c0_321 = arith.constant 0 : index
    %241 = vector.load %arg2[%c40, %c0_320, %c0_321] : memref<49x8x4xf32, #tpu.memory_space<vmem>>, vector<1x8x4xf32>
    %242 = vector.shape_cast %241 : vector<1x8x4xf32> to vector<8x4xf32>
    %c0_322 = arith.constant 0 : index
    %c1_323 = arith.constant 1 : index
    %c1_324 = arith.constant 1 : index
    %c0_325 = arith.constant 0 : index
    %c24_326 = arith.constant 24 : index
    %243 = vector.load %arg1[%c0_322, %c1_323, %c1_324, %c0_325, %c24_326] : memref<1x2x2x4x124xf32, #tpu.memory_space<vmem>>, vector<1x1x1x4x88xf32>
    %244 = vector.shape_cast %243 : vector<1x1x1x4x88xf32> to vector<4x88xf32>
    %cst_327 = arith.constant dense<0.000000e+00> : vector<8x88xf32>
    %245 = tpu.matmul %242, %244, %cst_327 {dimension_numbers = #tpu.dot_dimension_numbers<[1], [0], [0], [1], [0, 0, 1, 1], [], []>} : vector<8x4xf32>, vector<4x88xf32>, vector<8x88xf32> -> vector<8x88xf32>
    %246 = arith.addf %240, %245 : vector<8x88xf32>
    %c41 = arith.constant 41 : index
    %c0_328 = arith.constant 0 : index
    %c0_329 = arith.constant 0 : index
    %247 = vector.load %arg2[%c41, %c0_328, %c0_329] : memref<49x8x4xf32, #tpu.memory_space<vmem>>, vector<1x8x4xf32>
    %248 = vector.shape_cast %247 : vector<1x8x4xf32> to vector<8x4xf32>
    %c0_330 = arith.constant 0 : index
    %c1_331 = arith.constant 1 : index
    %c0_332 = arith.constant 0 : index
    %c0_333 = arith.constant 0 : index
    %c25_334 = arith.constant 25 : index
    %249 = vector.load %arg1[%c0_330, %c1_331, %c0_332, %c0_333, %c25_334] : memref<1x2x2x4x124xf32, #tpu.memory_space<vmem>>, vector<1x1x1x4x88xf32>
    %250 = vector.shape_cast %249 : vector<1x1x1x4x88xf32> to vector<4x88xf32>
    %cst_335 = arith.constant dense<0.000000e+00> : vector<8x88xf32>
    %251 = tpu.matmul %248, %250, %cst_335 {dimension_numbers = #tpu.dot_dimension_numbers<[1], [0], [0], [1], [0, 0, 1, 1], [], []>} : vector<8x4xf32>, vector<4x88xf32>, vector<8x88xf32> -> vector<8x88xf32>
    %252 = arith.addf %246, %251 : vector<8x88xf32>
    %c42 = arith.constant 42 : index
    %c0_336 = arith.constant 0 : index
    %c0_337 = arith.constant 0 : index
    %253 = vector.load %arg2[%c42, %c0_336, %c0_337] : memref<49x8x4xf32, #tpu.memory_space<vmem>>, vector<1x8x4xf32>
    %254 = vector.shape_cast %253 : vector<1x8x4xf32> to vector<8x4xf32>
    %c0_338 = arith.constant 0 : index
    %c0_339 = arith.constant 0 : index
    %c0_340 = arith.constant 0 : index
    %c0_341 = arith.constant 0 : index
    %c33_342 = arith.constant 33 : index
    %255 = vector.load %arg1[%c0_338, %c0_339, %c0_340, %c0_341, %c33_342] : memref<1x2x2x4x124xf32, #tpu.memory_space<vmem>>, vector<1x1x1x4x88xf32>
    %256 = vector.shape_cast %255 : vector<1x1x1x4x88xf32> to vector<4x88xf32>
    %cst_343 = arith.constant dense<0.000000e+00> : vector<8x88xf32>
    %257 = tpu.matmul %254, %256, %cst_343 {dimension_numbers = #tpu.dot_dimension_numbers<[1], [0], [0], [1], [0, 0, 1, 1], [], []>} : vector<8x4xf32>, vector<4x88xf32>, vector<8x88xf32> -> vector<8x88xf32>
    %258 = arith.addf %252, %257 : vector<8x88xf32>
    %c43 = arith.constant 43 : index
    %c0_344 = arith.constant 0 : index
    %c0_345 = arith.constant 0 : index
    %259 = vector.load %arg2[%c43, %c0_344, %c0_345] : memref<49x8x4xf32, #tpu.memory_space<vmem>>, vector<1x8x4xf32>
    %260 = vector.shape_cast %259 : vector<1x8x4xf32> to vector<8x4xf32>
    %c0_346 = arith.constant 0 : index
    %c0_347 = arith.constant 0 : index
    %c1_348 = arith.constant 1 : index
    %c0_349 = arith.constant 0 : index
    %c33_350 = arith.constant 33 : index
    %261 = vector.load %arg1[%c0_346, %c0_347, %c1_348, %c0_349, %c33_350] : memref<1x2x2x4x124xf32, #tpu.memory_space<vmem>>, vector<1x1x1x4x88xf32>
    %262 = vector.shape_cast %261 : vector<1x1x1x4x88xf32> to vector<4x88xf32>
    %cst_351 = arith.constant dense<0.000000e+00> : vector<8x88xf32>
    %263 = tpu.matmul %260, %262, %cst_351 {dimension_numbers = #tpu.dot_dimension_numbers<[1], [0], [0], [1], [0, 0, 1, 1], [], []>} : vector<8x4xf32>, vector<4x88xf32>, vector<8x88xf32> -> vector<8x88xf32>
    %264 = arith.addf %258, %263 : vector<8x88xf32>
    %c44 = arith.constant 44 : index
    %c0_352 = arith.constant 0 : index
    %c0_353 = arith.constant 0 : index
    %265 = vector.load %arg2[%c44, %c0_352, %c0_353] : memref<49x8x4xf32, #tpu.memory_space<vmem>>, vector<1x8x4xf32>
    %266 = vector.shape_cast %265 : vector<1x8x4xf32> to vector<8x4xf32>
    %c0_354 = arith.constant 0 : index
    %c0_355 = arith.constant 0 : index
    %c0_356 = arith.constant 0 : index
    %c0_357 = arith.constant 0 : index
    %c34_358 = arith.constant 34 : index
    %267 = vector.load %arg1[%c0_354, %c0_355, %c0_356, %c0_357, %c34_358] : memref<1x2x2x4x124xf32, #tpu.memory_space<vmem>>, vector<1x1x1x4x88xf32>
    %268 = vector.shape_cast %267 : vector<1x1x1x4x88xf32> to vector<4x88xf32>
    %cst_359 = arith.constant dense<0.000000e+00> : vector<8x88xf32>
    %269 = tpu.matmul %266, %268, %cst_359 {dimension_numbers = #tpu.dot_dimension_numbers<[1], [0], [0], [1], [0, 0, 1, 1], [], []>} : vector<8x4xf32>, vector<4x88xf32>, vector<8x88xf32> -> vector<8x88xf32>
    %270 = arith.addf %264, %269 : vector<8x88xf32>
    %c45 = arith.constant 45 : index
    %c0_360 = arith.constant 0 : index
    %c0_361 = arith.constant 0 : index
    %271 = vector.load %arg2[%c45, %c0_360, %c0_361] : memref<49x8x4xf32, #tpu.memory_space<vmem>>, vector<1x8x4xf32>
    %272 = vector.shape_cast %271 : vector<1x8x4xf32> to vector<8x4xf32>
    %c0_362 = arith.constant 0 : index
    %c0_363 = arith.constant 0 : index
    %c1_364 = arith.constant 1 : index
    %c0_365 = arith.constant 0 : index
    %c34_366 = arith.constant 34 : index
    %273 = vector.load %arg1[%c0_362, %c0_363, %c1_364, %c0_365, %c34_366] : memref<1x2x2x4x124xf32, #tpu.memory_space<vmem>>, vector<1x1x1x4x88xf32>
    %274 = vector.shape_cast %273 : vector<1x1x1x4x88xf32> to vector<4x88xf32>
    %cst_367 = arith.constant dense<0.000000e+00> : vector<8x88xf32>
    %275 = tpu.matmul %272, %274, %cst_367 {dimension_numbers = #tpu.dot_dimension_numbers<[1], [0], [0], [1], [0, 0, 1, 1], [], []>} : vector<8x4xf32>, vector<4x88xf32>, vector<8x88xf32> -> vector<8x88xf32>
    %276 = arith.addf %270, %275 : vector<8x88xf32>
    %c46 = arith.constant 46 : index
    %c0_368 = arith.constant 0 : index
    %c0_369 = arith.constant 0 : index
    %277 = vector.load %arg2[%c46, %c0_368, %c0_369] : memref<49x8x4xf32, #tpu.memory_space<vmem>>, vector<1x8x4xf32>
    %278 = vector.shape_cast %277 : vector<1x8x4xf32> to vector<8x4xf32>
    %c0_370 = arith.constant 0 : index
    %c0_371 = arith.constant 0 : index
    %c0_372 = arith.constant 0 : index
    %c0_373 = arith.constant 0 : index
    %c35_374 = arith.constant 35 : index
    %279 = vector.load %arg1[%c0_370, %c0_371, %c0_372, %c0_373, %c35_374] : memref<1x2x2x4x124xf32, #tpu.memory_space<vmem>>, vector<1x1x1x4x88xf32>
    %280 = vector.shape_cast %279 : vector<1x1x1x4x88xf32> to vector<4x88xf32>
    %cst_375 = arith.constant dense<0.000000e+00> : vector<8x88xf32>
    %281 = tpu.matmul %278, %280, %cst_375 {dimension_numbers = #tpu.dot_dimension_numbers<[1], [0], [0], [1], [0, 0, 1, 1], [], []>} : vector<8x4xf32>, vector<4x88xf32>, vector<8x88xf32> -> vector<8x88xf32>
    %282 = arith.addf %276, %281 : vector<8x88xf32>
    %c47 = arith.constant 47 : index
    %c0_376 = arith.constant 0 : index
    %c0_377 = arith.constant 0 : index
    %283 = vector.load %arg2[%c47, %c0_376, %c0_377] : memref<49x8x4xf32, #tpu.memory_space<vmem>>, vector<1x8x4xf32>
    %284 = vector.shape_cast %283 : vector<1x8x4xf32> to vector<8x4xf32>
    %c0_378 = arith.constant 0 : index
    %c0_379 = arith.constant 0 : index
    %c1_380 = arith.constant 1 : index
    %c0_381 = arith.constant 0 : index
    %c35_382 = arith.constant 35 : index
    %285 = vector.load %arg1[%c0_378, %c0_379, %c1_380, %c0_381, %c35_382] : memref<1x2x2x4x124xf32, #tpu.memory_space<vmem>>, vector<1x1x1x4x88xf32>
    %286 = vector.shape_cast %285 : vector<1x1x1x4x88xf32> to vector<4x88xf32>
    %cst_383 = arith.constant dense<0.000000e+00> : vector<8x88xf32>
    %287 = tpu.matmul %284, %286, %cst_383 {dimension_numbers = #tpu.dot_dimension_numbers<[1], [0], [0], [1], [0, 0, 1, 1], [], []>} : vector<8x4xf32>, vector<4x88xf32>, vector<8x88xf32> -> vector<8x88xf32>
    %288 = arith.addf %282, %287 : vector<8x88xf32>
    %c48 = arith.constant 48 : index
    %c0_384 = arith.constant 0 : index
    %c0_385 = arith.constant 0 : index
    %289 = vector.load %arg2[%c48, %c0_384, %c0_385] : memref<49x8x4xf32, #tpu.memory_space<vmem>>, vector<1x8x4xf32>
    %290 = vector.shape_cast %289 : vector<1x8x4xf32> to vector<8x4xf32>
    %c0_386 = arith.constant 0 : index
    %c0_387 = arith.constant 0 : index
    %c0_388 = arith.constant 0 : index
    %c0_389 = arith.constant 0 : index
    %c36_390 = arith.constant 36 : index
    %291 = vector.load %arg1[%c0_386, %c0_387, %c0_388, %c0_389, %c36_390] : memref<1x2x2x4x124xf32, #tpu.memory_space<vmem>>, vector<1x1x1x4x88xf32>
    %292 = vector.shape_cast %291 : vector<1x1x1x4x88xf32> to vector<4x88xf32>
    %cst_391 = arith.constant dense<0.000000e+00> : vector<8x88xf32>
    %293 = tpu.matmul %290, %292, %cst_391 {dimension_numbers = #tpu.dot_dimension_numbers<[1], [0], [0], [1], [0, 0, 1, 1], [], []>} : vector<8x4xf32>, vector<4x88xf32>, vector<8x88xf32> -> vector<8x88xf32>
    %294 = arith.addf %288, %293 : vector<8x88xf32>
    %c0_392 = arith.constant 0 : index
    %c0_393 = arith.constant 0 : index
    %295 = vector.load %arg3[%c0_392, %c0_393] : memref<8x1xf32, #tpu.memory_space<vmem>>, vector<8x1xf32>
    %296 = vector.broadcast %295 : vector<8x1xf32> to vector<8x88xf32>
    %297 = arith.addf %294, %296 : vector<8x88xf32>
    %c0_394 = arith.constant 0 : index
    %c0_395 = arith.constant 0 : index
    %c0_396 = arith.constant 0 : index
    %298 = vector.load %arg4[%c0_394, %c0_395, %c0_396] : memref<1x8x88xf32, #tpu.memory_space<vmem>>, vector<1x8x88xf32>
    %299 = vector.shape_cast %298 : vector<1x8x88xf32> to vector<8x88xf32>
    %300 = vector.shape_cast %297 : vector<8x88xf32> to vector<1x8x88xf32>
    tpu.vector_store %arg4[%c0_394, %c0_395, %c0_396], %300 {strides = array<i32>} : memref<1x8x88xf32, #tpu.memory_space<vmem>>, vector<1x8x88xf32>,
    return
  }
  func.func @transform_0(%arg0: i32) -> (i32, i32, i32, i32, i32) {
    %c0_i32 = arith.constant 0 : i32
    %c0_i32_0 = arith.constant 0 : i32
    %c0_i32_1 = arith.constant 0 : i32
    %c0_i32_2 = arith.constant 0 : i32
    %c0_i32_3 = arith.constant 0 : i32
    return %arg0, %c0_i32, %c0_i32_0, %c0_i32_1, %c0_i32_2 : i32, i32, i32, i32, i32
  }
  func.func @transform_1(%arg0: i32) -> (i32, i32, i32) {
    %c0_i32 = arith.constant 0 : i32
    %c0_i32_0 = arith.constant 0 : i32
    %c0_i32_1 = arith.constant 0 : i32
    %c0_i32_2 = arith.constant 0 : i32
    return %c0_i32, %c0_i32_0, %c0_i32_1 : i32, i32, i32
  }
  func.func @transform_2(%arg0: i32) -> (i32, i32) {
    %c0_i32 = arith.constant 0 : i32
    %c0_i32_0 = arith.constant 0 : i32
    %c0_i32_1 = arith.constant 0 : i32
    return %c0_i32, %c0_i32_0 : i32, i32
  }
  func.func @transform_3(%arg0: i32) -> (i32, i32, i32) {
    %c0_i32 = arith.constant 0 : i32
    %c0_i32_0 = arith.constant 0 : i32
    %c0_i32_1 = arith.constant 0 : i32
    return %arg0, %c0_i32, %c0_i32_0 : i32, i32, i32
  }
}

</mosaic_0001>

<bundles_post_ra>
// kernel: conv2d_pallas.1
= control target key start
LH: loop header
LB: loop body
LE: loop exit
PB: predicated region body
PF: predicated region fallthrough
CT: control target
= control target key end

     0   :  { %s4730_s12 = smov 0   ;;  %s5203_s0 = inlined_call_operand.vmem [shape: f32[2,2,2,4,124], index: 0, kind: input, shape index: {}]   ;;  %s5204_s1 = inlined_call_operand.vmem [shape: f32[49,8,4], index: 1, kind: input, shape index: {}]   ;;  %s5205_s2 = inlined_call_operand.vmem [shape: f32[8,1], index: 2, kind: input, shape index: {}]   ;;  %s5206_s3 = inlined_call_operand.vmem [shape: f32[2,8,88], index: 3, kind: output, shape index: {}]  }
   0x1 LB: > { %s4153_s13 = sadd.s32 4294967295, %s4690_s12   ;;  %p4157_p0 = scmp.ge.s32.totalorder %s4690_s12, 1  ;;  %s4690_s12 = sphi %s4730_s12, %s13_s12  }
   0x2   : > { %p137_p1 = scmp.lt.s32.totalorder %s4690_s12, 3 }
   0x4   : > { %p138_p2 = pnand %p4157_p0, %p137_p1 }
   0x5   : > { %p160_p3 = scmp.lt.s32.totalorder (!%p138_p2), %s4153_s13, 1  ;;  %s4694_s20 = smov (!%p138_p2), 127  }
   0x6   : > { %141 = sbr.rel (%p138_p2) target bundleno = 423 (0x1a7), region = 32  ;;  %s4695_s21 = smov (!%p138_p2), 126  }
   0x7   : > { %s4696_s24 = smov (!%p138_p2), 125   ;;  %s4697_s25 = smov (!%p138_p2), 117  }
   0x8   : > { %s4698_s26 = smov (!%p138_p2), 116   ;;  %s4699_s27 = smov (!%p138_p2), 115  }
   0x9   : > { %s4700_s28 = smov (!%p138_p2), 114   ;;  %s4701_s29 = smov (!%p138_p2), 106  }
   0xa   : > { %s4702_s30 = smov (!%p138_p2), 105   ;;  %s4703_s4 = smov (!%p138_p2), 104  }
   0xb   : > { %v4692_v0 = vmov 0.0   ;;  %vm4693_vm0 = vmmov 0   ;;  %s5208_s13 = smov (!%p160_p3, %s4153_s13), 1  ;;  %vm179_vm1 = vcmask 1043456   ;;  %v4161_v2 = vld [vmem:[%s5204_s1 + $0x8] sm:$0xff]  ;;  %vm175_vm2 = vcmask 31744  }
   0xc   : > { %4411 = vmatprep.subr.mxu0 %v4692_v0  ;;  %4413 = vmatprep.mubr.msk.f32.mxu0 %vm4693_vm0, %v4692_v0  ;;  %s4312_s14 = sshll.u32 %s5208_s13, 4  ;;  %v169_v4 = vld [vmem:[%s5204_s1] sm:$0xff]  ;;  %s4704_s5 = smov 103   ;;  %v4707_v7 = vmov 0   ;;  %v4167_v9 = vld [vmem:[%s5204_s1 + $0x10] sm:$0xff]  ;;  %v4170_v12 = vld [vmem:[%s5204_s1 + $0x18] sm:$0xff] }
   0xd   : > { %4416 = vmatprep.subr.mxu1 %v4692_v0  ;;  %4418 = vmatprep.mubr.msk.f32.mxu1 %vm4693_vm0, %v4692_v0  ;;  %s164_s17 = scalar_lea.vmem %s5203_s0, %s4312_s14  ;;  %s4705_s6 = smov 95   ;;  %v4091_v8 = vld [vmem:[%s5205_s2] sm:$0xff]  ;;  %v4176_v16 = vld [vmem:[%s5204_s1 + $0x28] sm:$0xff]  ;;  %v4179_v18 = vld [vmem:[%s5204_s1 + $0x30] sm:$0xff]  ;;  %vm4098_vm3 = vcmask 719872  }
   0xe   : > { %v4750_v1 = vld [vmem:[%s164_s17] sm:$0xf]  ;;  %v4757_v3 = vld [vmem:[%s164_s17 + $0x4] sm:$0xf]  ;;  %v4773_v5 = vld [vmem:[%s164_s17 + $0x8] sm:$0xf]  ;;  %4682 = vset.pattern.permute.xlu1 %v4707_v7  ;;  %4683 = vset.pattern.permute.xlu0 %v4707_v7 }
   0xf   : > { %331 = vrot.lane.b32.xlu0 %v4750_v1, %s4694_s20  ;;  %491 = vrot.lane.b32.xlu1 %v4750_v1, %s4695_s21  ;;  %v4780_v6 = vld [vmem:[%s164_s17 + $0xc] sm:$0xf]  ;;  %s4706_s7 = smov 94   ;;  %s4708_s8 = smov 93   ;;  %v4173_v15 = vld [vmem:[%s5204_s1 + $0x20] sm:$0xff] }
  0x10   : > { %4412 = vmatpush3.msk.msra.mxu0 %vm179_vm1, %v4757_v3  ;;  %4417 = vmatpush3.msk.msra.mxu1 %vm179_vm1, %v4750_v1  ;;  %s4709_s11 = smov 92   ;;  %v4182_v20 = vld [vmem:[%s5204_s1 + $0x38] sm:$0xff]  ;;  %v4186_v21 = vld [vmem:[%s5204_s1 + $0x40] sm:$0xff]  ;;  %v4190_v24 = vld [vmem:[%s5204_s1 + $0x48] sm:$0xff] }
  0x11   : > { %4421 = vmatprep.subr.mxu0 %v4692_v0  ;;  %4414 = vmatmul.mubr.msk.f32.vlgmr.msra.gmra.mxu0 %vm175_vm2, %v4161_v2  ;;  %v4193_v25 = vld [vmem:[%s5204_s1 + $0x50] sm:$0xff]  ;;  %v4196_v28 = vld [vmem:[%s5204_s1 + $0x58] sm:$0xff]  ;;  %v4199_v29 = vld [vmem:[%s5204_s1 + $0x60] sm:$0xff] }
  0x12   : > { %4419 = vmatmul.mubr.msk.f32.vlgmr.msra.gmra.mxu1 %vm175_vm2, %v169_v4  ;;  %4423 = vmatprep.mubr.msk.f32.mxu0 %vm4693_vm0, %v4692_v0  ;;  %v4202_v32 = vld [vmem:[%s5204_s1 + $0x68] sm:$0xff]  ;;  %v4205_v33 = vld [vmem:[%s5204_s1 + $0x70] sm:$0xff]  ;;  %v4208_v36 = vld [vmem:[%s5204_s1 + $0x78] sm:$0xff] }
  0x13   : > { %411 = vrot.lane.b32.xlu0 %v4757_v3, %s4694_s20  ;;  %571 = vrot.lane.b32.xlu1 %v4757_v3, %s4695_s21  ;;  %v4211_v37 = vld [vmem:[%s5204_s1 + $0x80] sm:$0xff]  ;;  %v4214_v40 = vld [vmem:[%s5204_s1 + $0x88] sm:$0xff] }
  0x14   : > { %4426 = vmatprep.subr.mxu1 %v4692_v0  ;;  %4428 = vmatprep.mubr.msk.f32.mxu1 %vm4693_vm0, %v4692_v0  ;;  %v4217_v41 = vld [vmem:[%s5204_s1 + $0x90] sm:$0xff]  ;;  %v4220_v44 = vld [vmem:[%s5204_s1 + $0x98] sm:$0xff]  ;;  %v4223_v45 = vld [vmem:[%s5204_s1 + $0xa0] sm:$0xff] }
  0x15   : > { %v4226_v48 = vld [vmem:[%s5204_s1 + $0xa8] sm:$0xff]  ;;  %v4229_v49 = vld [vmem:[%s5204_s1 + $0xb0] sm:$0xff]  ;;  %v4232_v52 = vld [vmem:[%s5204_s1 + $0xb8] sm:$0xff] }
  0x16   : > { %v4235_v53 = vld [vmem:[%s5204_s1 + $0xc0] sm:$0xff]  ;;  %v4238_v56 = vld [vmem:[%s5204_s1 + $0xc8] sm:$0xff]  ;;  %v4241_v57 = vld [vmem:[%s5204_s1 + $0xd0] sm:$0xff] }
  0x17   : > { %651 = vrot.lane.b32.xlu0 %v4750_v1, %s4696_s24  ;;  %893 = vrot.lane.b32.xlu1 %v4773_v5, %s4694_s20  ;;  %v4244_v60 = vld [vmem:[%s5204_s1 + $0xd8] sm:$0xff]  ;;  %v4247_v61 = vld [vmem:[%s5204_s1 + $0xe0] sm:$0xff] }
  0x18   : > { %v4253_v2 = vld [vmem:[%s5204_s1 + $0xf0] sm:$0xff] }
  0x1b   : > { %973 = vrot.lane.b32.xlu0 %v4780_v6, %s4694_s20  ;;  %1053 = vrot.lane.b32.xlu1 %v4773_v5, %s4695_s21 }
  0x1f   : > { %1133 = vrot.lane.b32.xlu0 %v4780_v6, %s4695_s21  ;;  %1213 = vrot.lane.b32.xlu1 %v4773_v5, %s4696_s24 }
  0x23   : > { %1293 = vrot.lane.b32.xlu0 %v4750_v1, %s4697_s25  ;;  %1373 = vrot.lane.b32.xlu1 %v4757_v3, %s4697_s25 }
  0x27   : > { %1453 = vrot.lane.b32.xlu0 %v4750_v1, %s4698_s26  ;;  %1533 = vrot.lane.b32.xlu1 %v4757_v3, %s4698_s26 }
  0x2b   : > { %1613 = vrot.lane.b32.xlu0 %v4750_v1, %s4699_s27  ;;  %1693 = vrot.lane.b32.xlu1 %v4757_v3, %s4699_s27 }
  0x2f   : > { %1773 = vrot.lane.b32.xlu0 %v4750_v1, %s4700_s28  ;;  %1853 = vrot.lane.b32.xlu1 %v4773_v5, %s4697_s25 }
  0x33   : > { %1933 = vrot.lane.b32.xlu0 %v4780_v6, %s4697_s25  ;;  %2013 = vrot.lane.b32.xlu1 %v4773_v5, %s4698_s26 }
  0x37   : > { %2093 = vrot.lane.b32.xlu0 %v4780_v6, %s4698_s26  ;;  %2173 = vrot.lane.b32.xlu1 %v4773_v5, %s4699_s27 }
  0x3b   : > { %2253 = vrot.lane.b32.xlu0 %v4780_v6, %s4699_s27  ;;  %2333 = vrot.lane.b32.xlu1 %v4773_v5, %s4700_s28 }
  0x3f   : > { %2413 = vrot.lane.b32.xlu0 %v4750_v1, %s4701_s29  ;;  %2493 = vrot.lane.b32.xlu1 %v4757_v3, %s4701_s29 }
  0x43   : > { %2573 = vrot.lane.b32.xlu0 %v4750_v1, %s4702_s30  ;;  %2653 = vrot.lane.b32.xlu1 %v4757_v3, %s4702_s30 }
  0x47   : > { %2733 = vrot.lane.b32.xlu0 %v4750_v1, %s4703_s4  ;;  %2813 = vrot.lane.b32.xlu1 %v4757_v3, %s4703_s4 }
  0x4b   : > { %2893 = vrot.lane.b32.xlu0 %v4750_v1, %s4704_s5  ;;  %2973 = vrot.lane.b32.xlu1 %v4773_v5, %s4701_s29 }
  0x4f   : > { %3053 = vrot.lane.b32.xlu0 %v4780_v6, %s4701_s29  ;;  %3133 = vrot.lane.b32.xlu1 %v4773_v5, %s4702_s30 }
  0x53   : > { %3213 = vrot.lane.b32.xlu0 %v4780_v6, %s4702_s30  ;;  %3293 = vrot.lane.b32.xlu1 %v4773_v5, %s4703_s4 }
  0x57   : > { %3373 = vrot.lane.b32.xlu0 %v4780_v6, %s4703_s4  ;;  %3453 = vrot.lane.b32.xlu1 %v4773_v5, %s4704_s5 }
  0x5b   : > { %3533 = vrot.lane.b32.xlu0 %v4750_v1, %s4705_s6  ;;  %3613 = vrot.lane.b32.xlu1 %v4757_v3, %s4705_s6  ;;  %s4160_s6 = sshll.u32 %s5208_s13, 3 }
  0x5c   : > { %s168_s9 = scalar_lea.vmem %s5206_s3, %s4160_s6 }
  0x5f   : > { %3693 = vrot.lane.b32.xlu0 %v4750_v1, %s4706_s7  ;;  %3773 = vrot.lane.b32.xlu1 %v4757_v3, %s4706_s7 }
  0x63   : > { %3853 = vrot.lane.b32.xlu0 %v4750_v1, %s4708_s8  ;;  %3933 = vrot.lane.b32.xlu1 %v4757_v3, %s4708_s8 }
  0x67   : > { %4013 = vrot.lane.b32.xlu0 %v4750_v1, %s4709_s11  ;;  %4094 = vperm.xlu1 %4682, %v4091_v8   ;;  %v4250_v1 = vld [vmem:[%s5204_s1 + $0xe8] sm:$0xff] }
  0x81   : > { %v332_v10 = vpop.permute.xlu0 %331  ;;  %v492_v11 = vpop.permute.xlu1 %491 }
  0x82   : > { %4422 = vmatpush3.msk.msra.mxu0 %vm179_vm1, %v332_v10  ;;  %v4265_v10 = vld [vmem:[%s5204_s1 + $0x110] sm:$0xff] }
  0x83   : > { %4431 = vmatprep.subr.mxu0 %v4692_v0  ;;  %4424 = vmatmul.mubr.msk.f32.vlgmr.msra.gmra.mxu0 %vm175_vm2, %v4167_v9  ;;  %v4262_v9 = vld [vmem:[%s5204_s1 + $0x108] sm:$0xff] }
  0x84   : > { %4432 = vmatpush3.msk.msra.mxu0 %vm179_vm1, %v492_v11  ;;  %4433 = vmatprep.mubr.msk.f32.mxu0 %vm4693_vm0, %v4692_v0 }
  0x85   : > { %v412_v13 = vpop.permute.xlu0 %411  ;;  %v572_v14 = vpop.permute.xlu1 %571  ;;  %4441 = vmatprep.subr.mxu0 %v4692_v0 }
  0x86   : > { %4427 = vmatpush3.msk.msra.mxu1 %vm179_vm1, %v412_v13  ;;  %v4268_v13 = vld [vmem:[%s5204_s1 + $0x118] sm:$0xff] }
  0x87   : > { %4429 = vmatmul.mubr.msk.f32.vlgmr.msra.gmra.mxu1 %vm175_vm2, %v4170_v12  ;;  %4436 = vmatprep.subr.mxu1 %v4692_v0 }
  0x88   : > { %4434 = vmatmul.mubr.msk.f32.vlgmr.msra.gmra.mxu0 %vm175_vm2, %v4173_v15  ;;  %4437 = vmatpush3.msk.msra.mxu1 %vm179_vm1, %v572_v14  ;;  %v4271_v14 = vld [vmem:[%s5204_s1 + $0x120] sm:$0xff] }
  0x89   : > { %v652_v17 = vpop.permute.xlu0 %651  ;;  %4438 = vmatprep.mubr.msk.f32.mxu1 %vm4693_vm0, %v4692_v0  ;;  %4443 = vmatprep.mubr.msk.f32.mxu0 %vm4693_vm0, %v4692_v0  ;;  %v894_v19 = vpop.permute.xlu1 %893 }
  0x8a   : > { %4442 = vmatpush3.msk.msra.mxu0 %vm179_vm1, %v652_v17  ;;  %4446 = vmatprep.subr.mxu1 %v4692_v0  ;;  %v4274_v17 = vld [vmem:[%s5204_s1 + $0x128] sm:$0xff] }
  0x8b   : > { %4439 = vmatmul.mubr.msk.f32.vlgmr.msra.gmra.mxu1 %vm175_vm2, %v4176_v16  ;;  %4451 = vmatprep.subr.mxu0 %v4692_v0 }
  0x8c   : > { %4444 = vmatmul.mubr.msk.f32.vlgmr.msra.gmra.mxu0 %vm175_vm2, %v4179_v18  ;;  %4447 = vmatpush3.msk.msra.mxu1 %vm179_vm1, %v4773_v5  ;;  %v4256_v5 = vld [vmem:[%s5204_s1 + $0xf8] sm:$0xff]  ;;  %v4277_v18 = vld [vmem:[%s5204_s1 + $0x130] sm:$0xff] }
  0x8d   : > { %4448 = vmatprep.mubr.msk.f32.mxu1 %vm4693_vm0, %v4692_v0  ;;  %4452 = vmatpush3.msk.msra.mxu0 %vm179_vm1, %v4780_v6  ;;  %v974_v22 = vpop.permute.xlu0 %973  ;;  %v1054_v23 = vpop.permute.xlu1 %1053  ;;  %v4259_v6 = vld [vmem:[%s5204_s1 + $0x100] sm:$0xff] }
  0x8e   : > { %4453 = vmatprep.mubr.msk.f32.mxu0 %vm4693_vm0, %v4692_v0  ;;  %4456 = vmatprep.subr.mxu1 %v4692_v0 }
  0x8f   : > { %4449 = vmatmul.mubr.msk.f32.vlgmr.msra.gmra.mxu1 %vm175_vm2, %v4182_v20  ;;  %4461 = vmatprep.subr.mxu0 %v4692_v0 }
  0x90   : > { %4454 = vmatmul.mubr.msk.f32.vlgmr.msra.gmra.mxu0 %vm175_vm2, %v4186_v21  ;;  %4457 = vmatpush3.msk.msra.mxu1 %vm179_vm1, %v894_v19  ;;  %v4280_v21 = vld [vmem:[%s5204_s1 + $0x138] sm:$0xff] }
  0x91   : > { %4458 = vmatprep.mubr.msk.f32.mxu1 %vm4693_vm0, %v4692_v0  ;;  %4462 = vmatpush3.msk.msra.mxu0 %vm179_vm1, %v974_v22  ;;  %v1134_v26 = vpop.permute.xlu0 %1133  ;;  %v1214_v27 = vpop.permute.xlu1 %1213  ;;  %v4283_v22 = vld [vmem:[%s5204_s1 + $0x140] sm:$0xff] }
  0x92   : > { %4463 = vmatprep.mubr.msk.f32.mxu0 %vm4693_vm0, %v4692_v0  ;;  %4466 = vmatprep.subr.mxu1 %v4692_v0 }
  0x93   : > { %4459 = vmatmul.mubr.msk.f32.vlgmr.msra.gmra.mxu1 %vm175_vm2, %v4190_v24  ;;  %4471 = vmatprep.subr.mxu0 %v4692_v0 }
  0x94   : > { %4464 = vmatmul.mubr.msk.f32.vlgmr.msra.gmra.mxu0 %vm175_vm2, %v4193_v25  ;;  %4467 = vmatpush3.msk.msra.mxu1 %vm179_vm1, %v1054_v23  ;;  %v4286_v25 = vld [vmem:[%s5204_s1 + $0x148] sm:$0xff] }
  0x95   : > { %4468 = vmatprep.mubr.msk.f32.mxu1 %vm4693_vm0, %v4692_v0  ;;  %4472 = vmatpush3.msk.msra.mxu0 %vm179_vm1, %v1134_v26  ;;  %v1294_v30 = vpop.permute.xlu0 %1293  ;;  %v1374_v31 = vpop.permute.xlu1 %1373  ;;  %v4289_v26 = vld [vmem:[%s5204_s1 + $0x150] sm:$0xff] }
  0x96   : > { %4473 = vmatprep.mubr.msk.f32.mxu0 %vm4693_vm0, %v4692_v0  ;;  %4476 = vmatprep.subr.mxu1 %v4692_v0 }
  0x97   : > { %4469 = vmatmul.mubr.msk.f32.vlgmr.msra.gmra.mxu1 %vm175_vm2, %v4196_v28  ;;  %4481 = vmatprep.subr.mxu0 %v4692_v0 }
  0x98   : > { %4474 = vmatmul.mubr.msk.f32.vlgmr.msra.gmra.mxu0 %vm175_vm2, %v4199_v29  ;;  %4477 = vmatpush3.msk.msra.mxu1 %vm179_vm1, %v1214_v27 }
  0x99   : > { %4478 = vmatprep.mubr.msk.f32.mxu1 %vm4693_vm0, %v4692_v0  ;;  %4482 = vmatpush3.msk.msra.mxu0 %vm179_vm1, %v1294_v30  ;;  %v1454_v34 = vpop.permute.xlu0 %1453  ;;  %v1534_v35 = vpop.permute.xlu1 %1533 }
  0x9a   : > { %4483 = vmatprep.mubr.msk.f32.mxu0 %vm4693_vm0, %v4692_v0  ;;  %4486 = vmatprep.subr.mxu1 %v4692_v0 }
  0x9b   : > { %4479 = vmatmul.mubr.msk.f32.vlgmr.msra.gmra.mxu1 %vm175_vm2, %v4202_v32  ;;  %4491 = vmatprep.subr.mxu0 %v4692_v0  ;;  %v4292_v32 = vld [vmem:[%s5204_s1 + $0x158] sm:$0xff] }
  0x9c   : > { %4484 = vmatmul.mubr.msk.f32.vlgmr.msra.gmra.mxu0 %vm175_vm2, %v4205_v33  ;;  %4487 = vmatpush3.msk.msra.mxu1 %vm179_vm1, %v1374_v31 }
  0x9d   : > { %4488 = vmatprep.mubr.msk.f32.mxu1 %vm4693_vm0, %v4692_v0  ;;  %4492 = vmatpush3.msk.msra.mxu0 %vm179_vm1, %v1454_v34  ;;  %v1614_v38 = vpop.permute.xlu0 %1613  ;;  %v1694_v39 = vpop.permute.xlu1 %1693 }
  0x9e   : > { %4493 = vmatprep.mubr.msk.f32.mxu0 %vm4693_vm0, %v4692_v0  ;;  %4496 = vmatprep.subr.mxu1 %v4692_v0 }
  0x9f   : > { %4489 = vmatmul.mubr.msk.f32.vlgmr.msra.gmra.mxu1 %vm175_vm2, %v4208_v36  ;;  %4501 = vmatprep.subr.mxu0 %v4692_v0 }
  0xa0   : > { %4494 = vmatmul.mubr.msk.f32.vlgmr.msra.gmra.mxu0 %vm175_vm2, %v4211_v37  ;;  %4497 = vmatpush3.msk.msra.mxu1 %vm179_vm1, %v1534_v35  ;;  %v4295_v35 = vld [vmem:[%s5204_s1 + $0x160] sm:$0xff]  ;;  %v4298_v37 = vld [vmem:[%s5204_s1 + $0x168] sm:$0xff] }
  0xa1   : > { %4498 = vmatprep.mubr.msk.f32.mxu1 %vm4693_vm0, %v4692_v0  ;;  %4502 = vmatpush3.msk.msra.mxu0 %vm179_vm1, %v1614_v38  ;;  %v1774_v42 = vpop.permute.xlu0 %1773  ;;  %v1854_v43 = vpop.permute.xlu1 %1853 }
  0xa2   : > { %4503 = vmatprep.mubr.msk.f32.mxu0 %vm4693_vm0, %v4692_v0  ;;  %4506 = vmatprep.subr.mxu1 %v4692_v0 }
  0xa3   : > { %4499 = vmatmul.mubr.msk.f32.vlgmr.msra.gmra.mxu1 %vm175_vm2, %v4214_v40  ;;  %4511 = vmatprep.subr.mxu0 %v4692_v0 }
  0xa4   : > { %4504 = vmatmul.mubr.msk.f32.vlgmr.msra.gmra.mxu0 %vm175_vm2, %v4217_v41  ;;  %4507 = vmatpush3.msk.msra.mxu1 %vm179_vm1, %v1694_v39  ;;  %v4301_v39 = vld [vmem:[%s5204_s1 + $0x170] sm:$0xff]  ;;  %v4304_v41 = vld [vmem:[%s5204_s1 + $0x178] sm:$0xff] }
  0xa5   : > { %4508 = vmatprep.mubr.msk.f32.mxu1 %vm4693_vm0, %v4692_v0  ;;  %4512 = vmatpush3.msk.msra.mxu0 %vm179_vm1, %v1774_v42  ;;  %v1934_v46 = vpop.permute.xlu0 %1933  ;;  %v2014_v47 = vpop.permute.xlu1 %2013  ;;  %v4307_v42 = vld [vmem:[%s5204_s1 + $0x180] sm:$0xff] }
  0xa6   : > { %4513 = vmatprep.mubr.msk.f32.mxu0 %vm4693_vm0, %v4692_v0  ;;  %4516 = vmatprep.subr.mxu1 %v4692_v0 }
  0xa7   : > { %4509 = vmatmul.mubr.msk.f32.vlgmr.msra.gmra.mxu1 %vm175_vm2, %v4220_v44  ;;  %4521 = vmatprep.subr.mxu0 %v4692_v0 }
  0xa8   : > { %4514 = vmatmul.mubr.msk.f32.vlgmr.msra.gmra.mxu0 %vm175_vm2, %v4223_v45  ;;  %4517 = vmatpush3.msk.msra.mxu1 %vm179_vm1, %v1854_v43 }
  0xa9   : > { %4518 = vmatprep.mubr.msk.f32.mxu1 %vm4693_vm0, %v4692_v0  ;;  %4522 = vmatpush3.msk.msra.mxu0 %vm179_vm1, %v1934_v46  ;;  %v2094_v50 = vpop.permute.xlu0 %2093  ;;  %v2174_v51 = vpop.permute.xlu1 %2173 }
  0xaa   : > { %4523 = vmatprep.mubr.msk.f32.mxu0 %vm4693_vm0, %v4692_v0  ;;  %4526 = vmatprep.subr.mxu1 %v4692_v0 }
  0xab   : > { %4519 = vmatmul.mubr.msk.f32.vlgmr.msra.gmra.mxu1 %vm175_vm2, %v4226_v48  ;;  %4531 = vmatprep.subr.mxu0 %v4692_v0 }
  0xac   : > { %4524 = vmatmul.mubr.msk.f32.vlgmr.msra.gmra.mxu0 %vm175_vm2, %v4229_v49  ;;  %4527 = vmatpush3.msk.msra.mxu1 %vm179_vm1, %v2014_v47 }
  0xad   : > { %4528 = vmatprep.mubr.msk.f32.mxu1 %vm4693_vm0, %v4692_v0  ;;  %4532 = vmatpush3.msk.msra.mxu0 %vm179_vm1, %v2094_v50  ;;  %v2254_v54 = vpop.permute.xlu0 %2253  ;;  %v2334_v55 = vpop.permute.xlu1 %2333 }
  0xae   : > { %4533 = vmatprep.mubr.msk.f32.mxu0 %vm4693_vm0, %v4692_v0  ;;  %4536 = vmatprep.subr.mxu1 %v4692_v0 }
  0xaf   : > { %4529 = vmatmul.mubr.msk.f32.vlgmr.msra.gmra.mxu1 %vm175_vm2, %v4232_v52  ;;  %4541 = vmatprep.subr.mxu0 %v4692_v0 }
  0xb0   : > { %4534 = vmatmul.mubr.msk.f32.vlgmr.msra.gmra.mxu0 %vm175_vm2, %v4235_v53  ;;  %4537 = vmatpush3.msk.msra.mxu1 %vm179_vm1, %v2174_v51 }
  0xb1   : > { %4538 = vmatprep.mubr.msk.f32.mxu1 %vm4693_vm0, %v4692_v0  ;;  %4542 = vmatpush3.msk.msra.mxu0 %vm179_vm1, %v2254_v54  ;;  %v2414_v58 = vpop.permute.xlu0 %2413  ;;  %v2494_v59 = vpop.permute.xlu1 %2493 }
  0xb2   : > { %4543 = vmatprep.mubr.msk.f32.mxu0 %vm4693_vm0, %v4692_v0  ;;  %4546 = vmatprep.subr.mxu1 %v4692_v0 }
  0xb3   : > { %4539 = vmatmul.mubr.msk.f32.vlgmr.msra.gmra.mxu1 %vm175_vm2, %v4238_v56  ;;  %4551 = vmatprep.subr.mxu0 %v4692_v0 }
  0xb4   : > { %4544 = vmatmul.mubr.msk.f32.vlgmr.msra.gmra.mxu0 %vm175_vm2, %v4241_v57  ;;  %4547 = vmatpush3.msk.msra.mxu1 %vm179_vm1, %v2334_v55 }
  0xb5   : > { %4548 = vmatprep.mubr.msk.f32.mxu1 %vm4693_vm0, %v4692_v0  ;;  %4552 = vmatpush3.msk.msra.mxu0 %vm179_vm1, %v2414_v58  ;;  %v2574_v62 = vpop.permute.xlu0 %2573  ;;  %v2654_v63 = vpop.permute.xlu1 %2653 }
  0xb6   : > { %4553 = vmatprep.mubr.msk.f32.mxu0 %vm4693_vm0, %v4692_v0  ;;  %4556 = vmatprep.subr.mxu1 %v4692_v0 }
  0xb7   : > { %4549 = vmatmul.mubr.msk.f32.vlgmr.msra.gmra.mxu1 %vm175_vm2, %v4244_v60  ;;  %4561 = vmatprep.subr.mxu0 %v4692_v0 }
  0xb8   : > { %4554 = vmatmul.mubr.msk.f32.vlgmr.msra.gmra.mxu0 %vm175_vm2, %v4247_v61  ;;  %4557 = vmatpush3.msk.msra.mxu1 %vm179_vm1, %v2494_v59 }
  0xb9   : > { %4558 = vmatprep.mubr.msk.f32.mxu1 %vm4693_vm0, %v4692_v0  ;;  %4562 = vmatpush3.msk.msra.mxu0 %vm179_vm1, %v2574_v62  ;;  %v2734_v3 = vpop.permute.xlu0 %2733  ;;  %v2814_v4 = vpop.permute.xlu1 %2813 }
  0xba   : > { %4563 = vmatprep.mubr.msk.f32.mxu0 %vm4693_vm0, %v4692_v0  ;;  %4566 = vmatprep.subr.mxu1 %v4692_v0 }
  0xbb   : > { %4559 = vmatmul.mubr.msk.f32.vlgmr.msra.gmra.mxu1 %vm175_vm2, %v4250_v1  ;;  %4571 = vmatprep.subr.mxu0 %v4692_v0 }
  0xbc   : > { %4564 = vmatmul.mubr.msk.f32.vlgmr.msra.gmra.mxu0 %vm175_vm2, %v4253_v2  ;;  %4567 = vmatpush3.msk.msra.mxu1 %vm179_vm1, %v2654_v63 }
  0xbd   : > { %4568 = vmatprep.mubr.msk.f32.mxu1 %vm4693_vm0, %v4692_v0  ;;  %4572 = vmatpush3.msk.msra.mxu0 %vm179_vm1, %v2734_v3  ;;  %v2894_v7 = vpop.permute.xlu0 %2893  ;;  %v2974_v8 = vpop.permute.xlu1 %2973 }
  0xbe   : > { %4573 = vmatprep.mubr.msk.f32.mxu0 %vm4693_vm0, %v4692_v0  ;;  %4576 = vmatprep.subr.mxu1 %v4692_v0 }
  0xbf   : > { %4569 = vmatmul.mubr.msk.f32.vlgmr.msra.gmra.mxu1 %vm175_vm2, %v4256_v5  ;;  %4581 = vmatprep.subr.mxu0 %v4692_v0 }
  0xc0   : > { %4574 = vmatmul.mubr.msk.f32.vlgmr.msra.gmra.mxu0 %vm175_vm2, %v4259_v6  ;;  %4577 = vmatpush3.msk.msra.mxu1 %vm179_vm1, %v2814_v4 }
  0xc1   : > { %4578 = vmatprep.mubr.msk.f32.mxu1 %vm4693_vm0, %v4692_v0  ;;  %4582 = vmatpush3.msk.msra.mxu0 %vm179_vm1, %v2894_v7  ;;  %v3054_v11 = vpop.permute.xlu0 %3053  ;;  %v3134_v12 = vpop.permute.xlu1 %3133 }
  0xc2   : > { %4583 = vmatprep.mubr.msk.f32.mxu0 %vm4693_vm0, %v4692_v0  ;;  %4586 = vmatprep.subr.mxu1 %v4692_v0 }
  0xc3   : > { %4579 = vmatmul.mubr.msk.f32.vlgmr.msra.gmra.mxu1 %vm175_vm2, %v4262_v9  ;;  %4591 = vmatprep.subr.mxu0 %v4692_v0 }
  0xc4   : > { %4584 = vmatmul.mubr.msk.f32.vlgmr.msra.gmra.mxu0 %vm175_vm2, %v4265_v10  ;;  %4587 = vmatpush3.msk.msra.mxu1 %vm179_vm1, %v2974_v8 }
  0xc5   : > { %4588 = vmatprep.mubr.msk.f32.mxu1 %vm4693_vm0, %v4692_v0  ;;  %4592 = vmatpush3.msk.msra.mxu0 %vm179_vm1, %v3054_v11  ;;  %v3214_v15 = vpop.permute.xlu0 %3213  ;;  %v3294_v16 = vpop.permute.xlu1 %3293 }
  0xc6   : > { %4593 = vmatprep.mubr.msk.f32.mxu0 %vm4693_vm0, %v4692_v0  ;;  %4596 = vmatprep.subr.mxu1 %v4692_v0 }
  0xc7   : > { %4589 = vmatmul.mubr.msk.f32.vlgmr.msra.gmra.mxu1 %vm175_vm2, %v4268_v13  ;;  %4601 = vmatprep.subr.mxu0 %v4692_v0 }
  0xc8   : > { %4594 = vmatmul.mubr.msk.f32.vlgmr.msra.gmra.mxu0 %vm175_vm2, %v4271_v14  ;;  %4597 = vmatpush3.msk.msra.mxu1 %vm179_vm1, %v3134_v12 }
  0xc9   : > { %4598 = vmatprep.mubr.msk.f32.mxu1 %vm4693_vm0, %v4692_v0  ;;  %4602 = vmatpush3.msk.msra.mxu0 %vm179_vm1, %v3214_v15  ;;  %v3374_v19 = vpop.permute.xlu0 %3373  ;;  %v3454_v20 = vpop.permute.xlu1 %3453 }
  0xca   : > { %4603 = vmatprep.mubr.msk.f32.mxu0 %vm4693_vm0, %v4692_v0  ;;  %4606 = vmatprep.subr.mxu1 %v4692_v0 }
  0xcb   : > { %4599 = vmatmul.mubr.msk.f32.vlgmr.msra.gmra.mxu1 %vm175_vm2, %v4274_v17  ;;  %4611 = vmatprep.subr.mxu0 %v4692_v0 }
  0xcc   : > { %4604 = vmatmul.mubr.msk.f32.vlgmr.msra.gmra.mxu0 %vm175_vm2, %v4277_v18  ;;  %4607 = vmatpush3.msk.msra.mxu1 %vm179_vm1, %v3294_v16 }
  0xcd   : > { %4608 = vmatprep.mubr.msk.f32.mxu1 %vm4693_vm0, %v4692_v0  ;;  %4612 = vmatpush3.msk.msra.mxu0 %vm179_vm1, %v3374_v19  ;;  %v3534_v23 = vpop.permute.xlu0 %3533  ;;  %v3614_v24 = vpop.permute.xlu1 %3613 }
  0xce   : > { %4613 = vmatprep.mubr.msk.f32.mxu0 %vm4693_vm0, %v4692_v0  ;;  %4616 = vmatprep.subr.mxu1 %v4692_v0 }
  0xcf   : > { %4609 = vmatmul.mubr.msk.f32.vlgmr.msra.gmra.mxu1 %vm175_vm2, %v4280_v21  ;;  %4621 = vmatprep.subr.mxu0 %v4692_v0 }
  0xd0   : > { %4614 = vmatmul.mubr.msk.f32.vlgmr.msra.gmra.mxu0 %vm175_vm2, %v4283_v22  ;;  %4617 = vmatpush3.msk.msra.mxu1 %vm179_vm1, %v3454_v20 }
  0xd1   : > { %4618 = vmatprep.mubr.msk.f32.mxu1 %vm4693_vm0, %v4692_v0  ;;  %4622 = vmatpush3.msk.msra.mxu0 %vm179_vm1, %v3534_v23  ;;  %v3694_v27 = vpop.permute.xlu0 %3693  ;;  %v249_v28 = vpop.f32.mrf.mxu0 }
  0xd2   : > { %4623 = vmatprep.mubr.msk.f32.mxu0 %vm4693_vm0, %v4692_v0  ;;  %4626 = vmatprep.subr.mxu1 %v4692_v0  ;;  %v325_v29 = vpop.f32.mrf.mxu1  ;;  %v3774_v30 = vpop.permute.xlu1 %3773 }
  0xd3   : > { %4619 = vmatmul.mubr.msk.f32.vlgmr.msra.gmra.mxu1 %vm175_vm2, %v4286_v25  ;;  %4631 = vmatprep.subr.mxu0 %v4692_v0  ;;  %v326_v31 = vadd.f32 %v325_v29, %v249_v28  ;;  %v4415_v33 = vpop.f32.mrf.mxu0 }
  0xd4   : > { %4624 = vmatmul.mubr.msk.f32.vlgmr.msra.gmra.mxu0 %vm175_vm2, %v4289_v26  ;;  %4627 = vmatpush3.msk.msra.mxu1 %vm179_vm1, %v3614_v24  ;;  %v4420_v34 = vpop.f32.mrf.mxu1 }
  0xd5   : > { %4628 = vmatprep.mubr.msk.f32.mxu1 %vm4693_vm0, %v4692_v0  ;;  %4632 = vmatpush3.msk.msra.mxu0 %vm179_vm1, %v3694_v27  ;;  %v3854_v36 = vpop.permute.xlu0 %3853 }
  0xd6   : > { %4633 = vmatprep.mubr.msk.f32.mxu0 %vm4693_vm0, %v4692_v0  ;;  %4636 = vmatprep.subr.mxu1 %v4692_v0  ;;  %v3934_v38 = vpop.permute.xlu1 %3933 }
  0xd7   : > { %4629 = vmatmul.mubr.msk.f32.vlgmr.msra.gmra.mxu1 %vm175_vm2, %v4292_v32  ;;  %4641 = vmatprep.subr.mxu0 %v4692_v0 }
  0xd8   : > { %4634 = vmatmul.mubr.msk.f32.vlgmr.msra.gmra.mxu0 %vm175_vm2, %v4295_v35  ;;  %4637 = vmatpush3.msk.msra.mxu1 %vm179_vm1, %v3774_v30 }
  0xd9   : > { %4638 = vmatprep.mubr.msk.f32.mxu1 %vm4693_vm0, %v4692_v0  ;;  %4642 = vmatpush3.msk.msra.mxu0 %vm179_vm1, %v3854_v36  ;;  %v4014_v40 = vpop.permute.xlu0 %4013 }
  0xda   : > { %4643 = vmatprep.mubr.msk.f32.mxu0 %vm4693_vm0, %v4692_v0  ;;  %4646 = vmatprep.subr.mxu1 %v4692_v0 }
  0xdb   : > { %4639 = vmatmul.mubr.msk.f32.vlgmr.msra.gmra.mxu1 %vm175_vm2, %v4298_v37  ;;  %4651 = vmatprep.subr.mxu0 %v4692_v0 }
  0xdc   : > { %4644 = vmatmul.mubr.msk.f32.vlgmr.msra.gmra.mxu0 %vm175_vm2, %v4301_v39  ;;  %4647 = vmatpush3.msk.msra.mxu1 %vm179_vm1, %v3934_v38 }
  0xdd   : > { %4648 = vmatprep.mubr.msk.f32.mxu1 %vm4693_vm0, %v4692_v0  ;;  %4652 = vmatpush3.msk.msra.mxu0 %vm179_vm1, %v4014_v40 }
  0xde   : > { %4653 = vmatprep.mubr.msk.f32.mxu0 %vm4693_vm0, %v4692_v0 }
  0xdf   : > { %4649 = vmatmul.mubr.msk.f32.vlgmr.msra.gmra.mxu1 %vm175_vm2, %v4304_v41 }
  0xe0   : > { %4654 = vmatmul.mubr.msk.f32.vlgmr.msra.gmra.mxu0 %vm175_vm2, %v4307_v42 }
 0x143   : > { %v404_v43 = vpop.f32.mrf.mxu0 }
 0x144   : > { %v408_v45 = vadd.f32 %v404_v43, %v326_v31 }
 0x145   : > { %v4425_v44 = vpop.f32.mrf.mxu0 }
 0x147   : > { %v484_v46 = vpop.f32.mrf.mxu1 }
 0x148   : > { %v488_v47 = vadd.f32 %v484_v46, %v408_v45  ;;  %v564_v48 = vpop.f32.mrf.mxu0 }
 0x149   : > { %v4430_v49 = vpop.f32.mrf.mxu1 }
 0x14a   : > { %v568_v50 = vadd.f32 %v564_v48, %v488_v47  ;;  %v4435_v51 = vpop.f32.mrf.mxu0 }
 0x14b   : > { %v644_v52 = vpop.f32.mrf.mxu1 }
 0x14c   : > { %v648_v53 = vadd.f32 %v644_v52, %v568_v50  ;;  %v724_v54 = vpop.f32.mrf.mxu0 }
 0x14d   : > { %v4440_v55 = vpop.f32.mrf.mxu1 }
 0x14e   : > { %v728_v56 = vadd.f32 %v724_v54, %v648_v53  ;;  %v4445_v57 = vpop.f32.mrf.mxu0 }
 0x14f   : > { %v805_v0 = vpop.f32.mrf.mxu1 }
 0x150   : > { %v809_v58 = vadd.f32 %v805_v0, %v728_v56  ;;  %v886_v59 = vpop.f32.mrf.mxu0 }
 0x151   : > { %v4450_v60 = vpop.f32.mrf.mxu1 }
 0x152   : > { %v890_v61 = vadd.f32 %v886_v59, %v809_v58  ;;  %v4455_v62 = vpop.f32.mrf.mxu0 }
 0x153   : > { %v966_v63 = vpop.f32.mrf.mxu1 }
 0x154   : > { %v970_v1 = vadd.f32 %v966_v63, %v890_v61  ;;  %v1046_v2 = vpop.f32.mrf.mxu0 }
 0x155   : > { %v4460_v3 = vpop.f32.mrf.mxu1 }
 0x156   : > { %v1050_v4 = vadd.f32 %v1046_v2, %v970_v1  ;;  %v4465_v5 = vpop.f32.mrf.mxu0 }
 0x157   : > { %v1126_v6 = vpop.f32.mrf.mxu1 }
 0x158   : > { %v1130_v7 = vadd.f32 %v1126_v6, %v1050_v4  ;;  %v1206_v8 = vpop.f32.mrf.mxu0 }
 0x159   : > { %v4470_v9 = vpop.f32.mrf.mxu1 }
 0x15a   : > { %v1210_v10 = vadd.f32 %v1206_v8, %v1130_v7  ;;  %v4475_v11 = vpop.f32.mrf.mxu0 }
 0x15b   : > { %v1286_v12 = vpop.f32.mrf.mxu1 }
 0x15c   : > { %v1290_v13 = vadd.f32 %v1286_v12, %v1210_v10  ;;  %v1366_v14 = vpop.f32.mrf.mxu0 }
 0x15d   : > { %v4480_v15 = vpop.f32.mrf.mxu1 }
 0x15e   : > { %v1370_v16 = vadd.f32 %v1366_v14, %v1290_v13  ;;  %v4485_v17 = vpop.f32.mrf.mxu0 }
 0x15f   : > { %v1446_v18 = vpop.f32.mrf.mxu1 }
 0x160   : > { %v1450_v19 = vadd.f32 %v1446_v18, %v1370_v16  ;;  %v1526_v20 = vpop.f32.mrf.mxu0 }
 0x161   : > { %v4490_v21 = vpop.f32.mrf.mxu1 }
 0x162   : > { %v1530_v22 = vadd.f32 %v1526_v20, %v1450_v19  ;;  %v4495_v23 = vpop.f32.mrf.mxu0 }
 0x163   : > { %v1606_v24 = vpop.f32.mrf.mxu1 }
 0x164   : > { %v1610_v25 = vadd.f32 %v1606_v24, %v1530_v22  ;;  %v1686_v26 = vpop.f32.mrf.mxu0 }
 0x165   : > { %v4500_v27 = vpop.f32.mrf.mxu1 }
 0x166   : > { %v1690_v28 = vadd.f32 %v1686_v26, %v1610_v25  ;;  %v4505_v29 = vpop.f32.mrf.mxu0 }
 0x167   : > { %v1766_v30 = vpop.f32.mrf.mxu1 }
 0x168   : > { %v1770_v31 = vadd.f32 %v1766_v30, %v1690_v28  ;;  %v1846_v32 = vpop.f32.mrf.mxu0 }
 0x169   : > { %v4510_v33 = vpop.f32.mrf.mxu1 }
 0x16a   : > { %v1850_v34 = vadd.f32 %v1846_v32, %v1770_v31  ;;  %v4515_v35 = vpop.f32.mrf.mxu0 }
 0x16b   : > { %v1926_v36 = vpop.f32.mrf.mxu1 }
 0x16c   : > { %v1930_v37 = vadd.f32 %v1926_v36, %v1850_v34  ;;  %v2006_v38 = vpop.f32.mrf.mxu0 }
 0x16d   : > { %v4520_v39 = vpop.f32.mrf.mxu1 }
 0x16e   : > { %v2010_v40 = vadd.f32 %v2006_v38, %v1930_v37  ;;  %v4525_v41 = vpop.f32.mrf.mxu0 }
 0x16f   : > { %v2086_v42 = vpop.f32.mrf.mxu1 }
 0x170   : > { %v2090_v43 = vadd.f32 %v2086_v42, %v2010_v40  ;;  %v2166_v44 = vpop.f32.mrf.mxu0 }
 0x171   : > { %v4530_v45 = vpop.f32.mrf.mxu1 }
 0x172   : > { %v2170_v46 = vadd.f32 %v2166_v44, %v2090_v43  ;;  %v4535_v47 = vpop.f32.mrf.mxu0 }
 0x173   : > { %v2246_v48 = vpop.f32.mrf.mxu1 }
 0x174   : > { %v2250_v49 = vadd.f32 %v2246_v48, %v2170_v46  ;;  %v2326_v50 = vpop.f32.mrf.mxu0 }
 0x175   : > { %v4540_v51 = vpop.f32.mrf.mxu1 }
 0x176   : > { %v2330_v52 = vadd.f32 %v2326_v50, %v2250_v49  ;;  %v4545_v53 = vpop.f32.mrf.mxu0 }
 0x177   : > { %v2406_v54 = vpop.f32.mrf.mxu1 }
 0x178   : > { %v2410_v55 = vadd.f32 %v2406_v54, %v2330_v52  ;;  %v2486_v56 = vpop.f32.mrf.mxu0  ;;  %v4095_v54 = vpop.permute.xlu1 %4094 }
 0x179   : > { %v4550_v57 = vpop.f32.mrf.mxu1 }
 0x17a   : > { %v2490_v0 = vadd.f32 %v2486_v56, %v2410_v55  ;;  %v4555_v58 = vpop.f32.mrf.mxu0 }
 0x17b   : > { %v2566_v59 = vpop.f32.mrf.mxu1 }
 0x17c   : > { %v2570_v60 = vadd.f32 %v2566_v59, %v2490_v0  ;;  %v2646_v61 = vpop.f32.mrf.mxu0 }
 0x17d   : > { %v4560_v62 = vpop.f32.mrf.mxu1 }
 0x17e   : > { %v2650_v63 = vadd.f32 %v2646_v61, %v2570_v60  ;;  %v4565_v1 = vpop.f32.mrf.mxu0 }
 0x17f   : > { %v2726_v2 = vpop.f32.mrf.mxu1 }
 0x180   : > { %v2730_v3 = vadd.f32 %v2726_v2, %v2650_v63  ;;  %v2806_v4 = vpop.f32.mrf.mxu0 }
 0x181   : > { %v4570_v5 = vpop.f32.mrf.mxu1 }
 0x182   : > { %v2810_v6 = vadd.f32 %v2806_v4, %v2730_v3  ;;  %v4575_v7 = vpop.f32.mrf.mxu0 }
 0x183   : > { %v2886_v8 = vpop.f32.mrf.mxu1 }
 0x184   : > { %v2890_v9 = vadd.f32 %v2886_v8, %v2810_v6  ;;  %v2966_v10 = vpop.f32.mrf.mxu0 }
 0x185   : > { %v4580_v11 = vpop.f32.mrf.mxu1 }
 0x186   : > { %v2970_v12 = vadd.f32 %v2966_v10, %v2890_v9  ;;  %v4585_v13 = vpop.f32.mrf.mxu0 }
 0x187   : > { %v3046_v14 = vpop.f32.mrf.mxu1 }
 0x188   : > { %v3050_v15 = vadd.f32 %v3046_v14, %v2970_v12  ;;  %v3126_v16 = vpop.f32.mrf.mxu0 }
 0x189   : > { %v4590_v17 = vpop.f32.mrf.mxu1 }
 0x18a   : > { %v3130_v18 = vadd.f32 %v3126_v16, %v3050_v15  ;;  %v4595_v19 = vpop.f32.mrf.mxu0 }
 0x18b   : > { %v3206_v20 = vpop.f32.mrf.mxu1 }
 0x18c   : > { %v3210_v21 = vadd.f32 %v3206_v20, %v3130_v18  ;;  %v3286_v22 = vpop.f32.mrf.mxu0 }
 0x18d   : > { %v4600_v23 = vpop.f32.mrf.mxu1 }
 0x18e   : > { %v3290_v24 = vadd.f32 %v3286_v22, %v3210_v21  ;;  %v4605_v25 = vpop.f32.mrf.mxu0 }
 0x18f   : > { %v3366_v26 = vpop.f32.mrf.mxu1 }
 0x190   : > { %v3370_v27 = vadd.f32 %v3366_v26, %v3290_v24  ;;  %v3446_v28 = vpop.f32.mrf.mxu0 }
 0x191   : > { %v4610_v29 = vpop.f32.mrf.mxu1 }
 0x192   : > { %v3450_v30 = vadd.f32 %v3446_v28, %v3370_v27  ;;  %v4615_v31 = vpop.f32.mrf.mxu0 }
 0x193   : > { %v3526_v32 = vpop.f32.mrf.mxu1 }
 0x194   : > { %v3530_v33 = vadd.f32 %v3526_v32, %v3450_v30  ;;  %v3606_v34 = vpop.f32.mrf.mxu0 }
 0x195   : > { %v4620_v35 = vpop.f32.mrf.mxu1 }
 0x196   : > { %v3610_v36 = vadd.f32 %v3606_v34, %v3530_v33  ;;  %v4625_v37 = vpop.f32.mrf.mxu0 }
 0x197   : > { %v3686_v38 = vpop.f32.mrf.mxu1 }
 0x198   : > { %v3690_v39 = vadd.f32 %v3686_v38, %v3610_v36  ;;  %v3766_v40 = vpop.f32.mrf.mxu0 }
 0x199   : > { %v4630_v41 = vpop.f32.mrf.mxu1 }
 0x19a   : > { %v3770_v42 = vadd.f32 %v3766_v40, %v3690_v39  ;;  %v4635_v43 = vpop.f32.mrf.mxu0 }
 0x19b   : > { %v3846_v44 = vpop.f32.mrf.mxu1 }
 0x19c   : > { %v3850_v45 = vadd.f32 %v3846_v44, %v3770_v42  ;;  %v3926_v46 = vpop.f32.mrf.mxu0 }
 0x19d   : > { %v4640_v47 = vpop.f32.mrf.mxu1 }
 0x19e   : > { %v3930_v48 = vadd.f32 %v3926_v46, %v3850_v45  ;;  %v4645_v49 = vpop.f32.mrf.mxu0 }
 0x19f   : > { %v4006_v50 = vpop.f32.mrf.mxu1 }
 0x1a0   : > { %v4010_v51 = vadd.f32 %v4006_v50, %v3930_v48  ;;  %v4086_v52 = vpop.f32.mrf.mxu0 }
 0x1a1   : > { %v4650_v53 = vpop.f32.mrf.mxu1 }
 0x1a2   : > { %v4090_v55 = vadd.f32 %v4086_v52, %v4010_v51  ;;  %v4655_v56 = vpop.f32.mrf.mxu0 }
 0x1a4   : > { %v4097_v57 = vadd.f32 %v4095_v54, %v4090_v55 }
 0x1a6   : > { %4099 = vst.msk [vmem:[%s168_s9] sm:$0xff] %vm4098_vm3, %v4097_v57 }
 0x1a7 PF: > { %s13_s12 = sadd.s32 1, %s4690_s12  }
 0x1a8   : > { %p10_p4 = scmp.ge.s32.totalorder %s13_s12, 4  }
 0x1aa   :  { %12 = sbr.rel (!%p10_p4) target bundleno = 1 (0x1), region = 113 }

</bundles_post_ra>
